<compile_context>
chip_gen: v5e
topology: v5e:2x2
jax: 0.10.0
libtpu: 0.0.40
codegen_flags: <defaults>
</compile_context>

<pallas_src>
import jax
import jax.numpy as jnp
from jax.experimental import pallas as pl
from jax.experimental.pallas import tpu as pltpu

HIDDEN = 768          # BERT hidden size (module fixes 768*2 -> 256 -> 1)
MLP_MID = 256
MLP_OUT = 1
MAX_TILE = 512        # batch-tile cap (keeps double-buffered VMEM tiny)


def _mlp_kernel(t1_ref, t2_ref, w1a_ref, w1b_ref, b1_ref, w2_ref, b2_ref, o_ref):
    """Fused Linear(1536->256) -> ReLU -> Linear(256->1) -> Sigmoid, one batch tile."""
    # Layer 1: two K=768 bf16 matmuls on the MXU, f32 accumulation (concat fused).
    h = jnp.dot(t1_ref[...], w1a_ref[...], preferred_element_type=jnp.float32)
    h = h + jnp.dot(t2_ref[...], w1b_ref[...], preferred_element_type=jnp.float32)
    h = jnp.maximum(h + b1_ref[...], 0.0)                    # bias + ReLU (VPU, f32)
    # Layer 2 (N=1): VPU multiply + lane reduction instead of a skinny MXU matmul.
    y = jnp.sum(h * w2_ref[...], axis=-1, keepdims=True) + b2_ref[0, 0]
    o_ref[...] = jax.nn.sigmoid(y)                            # EUP


def prepare_params(w1, b1, w2, b2):
    """One-time parameter prep (casts / split / reshape hoisted out of forward)."""
    w1 = jnp.asarray(w1)
    w1a = w1[:HIDDEN].astype(jnp.bfloat16)                   # (768, 256) text_1 half
    w1b = w1[HIDDEN:].astype(jnp.bfloat16)                   # (768, 256) text_2 half
    b1_row = jnp.asarray(b1, jnp.float32).reshape(1, MLP_MID)
    w2_row = jnp.asarray(w2, jnp.float32).reshape(1, MLP_MID)
    b2_s = jnp.asarray(b2, jnp.float32).reshape(1, 1)
    return w1a, w1b, b1_row, w2_row, b2_s


@jax.jit
def sentence_similarity_forward(text_1, text_2, w1a, w1b, b1_row, w2_row, b2_s):
    """Equivalent of SentenceSimilarityModel.forward for tensor inputs.

    text_1, text_2: (B, 768) embeddings (e.g. BERT pooler outputs).
    Returns: (B, 1) float32 similarity probabilities.
    """
    B = text_1.shape[0]
    t1 = text_1.astype(jnp.bfloat16)
    t2 = text_2.astype(jnp.bfloat16)

    # Batch tile: pad to a multiple of 16 (bf16 sublane packing); cap the tile so
    # double-buffered activations + resident weights fit any VMEM budget.
    tb = MAX_TILE if B > MAX_TILE else max(16, ((B + 15) // 16) * 16)
    Bp = ((B + tb - 1) // tb) * tb
    if Bp != B:
        pad = ((0, Bp - B), (0, 0))
        t1 = jnp.pad(t1, pad)
        t2 = jnp.pad(t2, pad)
    nb = Bp // tb

    cost = pl.CostEstimate(
        flops=2 * Bp * (2 * HIDDEN) * MLP_MID + 2 * Bp * MLP_MID,
        transcendentals=Bp,
        bytes_accessed=(t1.size + t2.size) * 2               # bf16 activations
        + (w1a.size + w1b.size) * 2                           # bf16 weights
        + (b1_row.size + w2_row.size + b2_s.size) * 4         # f32 small params
        + Bp * MLP_OUT * 4,                                   # f32 output
    )

    out = pl.pallas_call(
        _mlp_kernel,
        out_shape=jax.ShapeDtypeStruct((Bp, MLP_OUT), jnp.float32),
        grid=(nb,),
        in_specs=[
            pl.BlockSpec((tb, HIDDEN), lambda i: (i, 0)),        # text_1 tile
            pl.BlockSpec((tb, HIDDEN), lambda i: (i, 0)),        # text_2 tile
            pl.BlockSpec((HIDDEN, MLP_MID), lambda i: (0, 0)),   # w1a (VMEM-resident)
            pl.BlockSpec((HIDDEN, MLP_MID), lambda i: (0, 0)),   # w1b (VMEM-resident)
            pl.BlockSpec((1, MLP_MID), lambda i: (0, 0)),        # b1 row
            pl.BlockSpec((1, MLP_MID), lambda i: (0, 0)),        # w2 row
            pl.BlockSpec(memory_space=pltpu.MemorySpace.SMEM),   # b2 scalar
        ],
        out_specs=pl.BlockSpec((tb, MLP_OUT), lambda i: (i, 0)),
        compiler_params=pltpu.CompilerParams(
            dimension_semantics=("parallel",)),
        cost_estimate=cost,
    )(t1, t2, w1a, w1b, b1_row, w2_row, b2_s)

    return out[:B]


def _reference(text_1, text_2, w1, b1, w2, b2):
    x = jnp.concatenate([text_1, text_2], axis=1)
    h = jnp.maximum(x @ w1 + b1.reshape(1, -1), 0.0)
    return jax.nn.sigmoid(h @ w2 + b2.reshape(1, -1))


if __name__ == "__main__":
    key = jax.random.PRNGKey(0)
    k_x1, k_x2, k_w1, k_b1, k_w2, k_b2 = jax.random.split(key, 6)

    B = 8  # small batch of (text_1, text_2) embedding pairs

    # Synthetic BERT pooler outputs (would come from self.bert in PyTorch).
    text_1 = jax.random.normal(k_x1, (B, HIDDEN), dtype=jnp.float32)
    text_2 = jax.random.normal(k_x2, (B, HIDDEN), dtype=jnp.float32)

    # nn.Linear(1536, 256) and nn.Linear(256, 1) parameters.
    w1 = jax.random.normal(k_w1, (2 * HIDDEN, MLP_MID), dtype=jnp.float32) * 0.02
    b1 = jax.random.normal(k_b1, (MLP_MID,), dtype=jnp.float32) * 0.02
    w2 = jax.random.normal(k_w2, (MLP_MID, MLP_OUT), dtype=jnp.float32) * 0.02
    b2 = jax.random.normal(k_b2, (MLP_OUT,), dtype=jnp.float32) * 0.02

    params = prepare_params(w1, b1, w2, b2)   # done once, outside the hot path

    out = sentence_similarity_forward(text_1, text_2, *params)
    out = jax.block_until_ready(out)

    ref = _reference(text_1, text_2, w1, b1, w2, b2)
    assert out.shape == (B, MLP_OUT), out.shape
    # Layer-1 inputs are bf16 (f32 accumulation), so use a bf16-appropriate tolerance.
    assert jnp.allclose(out, ref, atol=2e-2, rtol=2e-2), "mismatch vs reference"

    print("KERNEL_OK")
</pallas_src>

<mosaic_0001>
module attributes {stable_mosaic.version = 11 : i64} {
  func.func @_mlp_kernel(%arg0: i32, %arg1: memref<16x768xbf16, #tpu.memory_space<vmem>>, %arg2: memref<16x768xbf16, #tpu.memory_space<vmem>>, %arg3: memref<768x256xbf16, #tpu.memory_space<vmem>>, %arg4: memref<768x256xbf16, #tpu.memory_space<vmem>>, %arg5: memref<1x256xf32, #tpu.memory_space<vmem>>, %arg6: memref<1x256xf32, #tpu.memory_space<vmem>>, %arg7: memref<1x1xf32, #tpu.memory_space<smem>>, %arg8: memref<16x1xf32, #tpu.memory_space<vmem>>) attributes {dimension_semantics = [#tpu.dimension_semantics<parallel>], iteration_bounds = array<i64: 1>, scalar_prefetch = 0 : i64, scratch_operands = 0 : i64, tpu.core_type = #tpu.core_type<tc>, window_params = [{transform_indices = @transform_0, window_bounds = array<i64: 16, 768>}, {transform_indices = @transform_1, window_bounds = array<i64: 16, 768>}, {pipeline_mode = #tpu.pipeline_mode<synchronous>, transform_indices = @transform_2, window_bounds = array<i64: 768, 256>}, {pipeline_mode = #tpu.pipeline_mode<synchronous>, transform_indices = @transform_3, window_bounds = array<i64: 768, 256>}, {pipeline_mode = #tpu.pipeline_mode<synchronous>, transform_indices = @transform_4, window_bounds = array<i64: 1, 256>}, {pipeline_mode = #tpu.pipeline_mode<synchronous>, transform_indices = @transform_5, window_bounds = array<i64: 1, 256>}, {transform_indices = @transform_6, window_bounds = array<i64: 1, 1>}, {transform_indices = @transform_7, window_bounds = array<i64: 16, 1>}]} {
    %c0 = arith.constant 0 : index
    %c0_0 = arith.constant 0 : index
    %0 = vector.load %arg1[%c0, %c0_0] : memref<16x768xbf16, #tpu.memory_space<vmem>>, vector<16x768xbf16>
    %c0_1 = arith.constant 0 : index
    %c0_2 = arith.constant 0 : index
    %1 = vector.load %arg3[%c0_1, %c0_2] : memref<768x256xbf16, #tpu.memory_space<vmem>>, vector<768x256xbf16>
    %cst = arith.constant dense<0.000000e+00> : vector<16x256xf32>
    %2 = tpu.matmul %0, %1, %cst {dimension_numbers = #tpu.dot_dimension_numbers<[1], [0], [0], [1], [0, 0, 1, 1], [], []>} : vector<16x768xbf16>, vector<768x256xbf16>, vector<16x256xf32> -> vector<16x256xf32>
    %c0_3 = arith.constant 0 : index
    %c0_4 = arith.constant 0 : index
    %3 = vector.load %arg2[%c0_3, %c0_4] : memref<16x768xbf16, #tpu.memory_space<vmem>>, vector<16x768xbf16>
    %c0_5 = arith.constant 0 : index
    %c0_6 = arith.constant 0 : index
    %4 = vector.load %arg4[%c0_5, %c0_6] : memref<768x256xbf16, #tpu.memory_space<vmem>>, vector<768x256xbf16>
    %cst_7 = arith.constant dense<0.000000e+00> : vector<16x256xf32>
    %5 = tpu.matmul %3, %4, %cst_7 {dimension_numbers = #tpu.dot_dimension_numbers<[1], [0], [0], [1], [0, 0, 1, 1], [], []>} : vector<16x768xbf16>, vector<768x256xbf16>, vector<16x256xf32> -> vector<16x256xf32>
    %6 = arith.addf %2, %5 : vector<16x256xf32>
    %c0_8 = arith.constant 0 : index
    %c0_9 = arith.constant 0 : index
    %7 = vector.load %arg5[%c0_8, %c0_9] : memref<1x256xf32, #tpu.memory_space<vmem>>, vector<1x256xf32>
    %8 = vector.broadcast %7 : vector<1x256xf32> to vector<16x256xf32>
    %9 = arith.addf %6, %8 : vector<16x256xf32>
    %cst_10 = arith.constant 0.000000e+00 : f32
    %10 = vector.broadcast %cst_10 : f32 to vector<16x256xf32>
    %11 = arith.maximumf %9, %10 : vector<16x256xf32>
    %c0_11 = arith.constant 0 : index
    %c0_12 = arith.constant 0 : index
    %12 = vector.load %arg6[%c0_11, %c0_12] : memref<1x256xf32, #tpu.memory_space<vmem>>, vector<1x256xf32>
    %13 = vector.broadcast %12 : vector<1x256xf32> to vector<16x256xf32>
    %14 = arith.mulf %11, %13 : vector<16x256xf32>
    %cst_13 = arith.constant dense<0.000000e+00> : vector<16xf32>
    %15 = vector.multi_reduction <add>, %14, %cst_13 [1] : vector<16x256xf32> to vector<16xf32>
    %16 = vector.shape_cast %15 : vector<16xf32> to vector<16x1xf32>
    %c0_14 = arith.constant 0 : index
    %c0_15 = arith.constant 0 : index
    %17 = memref.load %arg7[%c0_14, %c0_15] : memref<1x1xf32, #tpu.memory_space<smem>>
    %18 = vector.broadcast %17 : f32 to vector<16x1xf32>
    %19 = arith.addf %16, %18 : vector<16x1xf32>
    %20 = arith.negf %19 : vector<16x1xf32>
    %21 = math.exp %20 : vector<16x1xf32>
    %cst_16 = arith.constant 1.000000e+00 : f32
    %22 = vector.broadcast %cst_16 : f32 to vector<16x1xf32>
    %23 = arith.addf %22, %21 : vector<16x1xf32>
    %24 = arith.divf %22, %23 : vector<16x1xf32>
    %c0_17 = arith.constant 0 : index
    %c0_18 = arith.constant 0 : index
    %25 = vector.load %arg8[%c0_17, %c0_18] : memref<16x1xf32, #tpu.memory_space<vmem>>, vector<16x1xf32>
    tpu.vector_store %arg8[%c0_17, %c0_18], %24 {strides = array<i32>} : memref<16x1xf32, #tpu.memory_space<vmem>>, vector<16x1xf32>,
    return
  }
  func.func @transform_0(%arg0: i32) -> (i32, i32) {
    %c0_i32 = arith.constant 0 : i32
    %c0_i32_0 = arith.constant 0 : i32
    return %arg0, %c0_i32 : i32, i32
  }
  func.func @transform_1(%arg0: i32) -> (i32, i32) {
    %c0_i32 = arith.constant 0 : i32
    %c0_i32_0 = arith.constant 0 : i32
    return %arg0, %c0_i32 : i32, i32
  }
  func.func @transform_2(%arg0: i32) -> (i32, i32) {
    %c0_i32 = arith.constant 0 : i32
    %c0_i32_0 = arith.constant 0 : i32
    %c0_i32_1 = arith.constant 0 : i32
    return %c0_i32, %c0_i32_0 : i32, i32
  }
  func.func @transform_3(%arg0: i32) -> (i32, i32) {
    %c0_i32 = arith.constant 0 : i32
    %c0_i32_0 = arith.constant 0 : i32
    %c0_i32_1 = arith.constant 0 : i32
    return %c0_i32, %c0_i32_0 : i32, i32
  }
  func.func @transform_4(%arg0: i32) -> (i32, i32) {
    %c0_i32 = arith.constant 0 : i32
    %c0_i32_0 = arith.constant 0 : i32
    %c0_i32_1 = arith.constant 0 : i32
    return %c0_i32, %c0_i32_0 : i32, i32
  }
  func.func @transform_5(%arg0: i32) -> (i32, i32) {
    %c0_i32 = arith.constant 0 : i32
    %c0_i32_0 = arith.constant 0 : i32
    %c0_i32_1 = arith.constant 0 : i32
    return %c0_i32, %c0_i32_0 : i32, i32
  }
  func.func @transform_6(%arg0: i32) -> (i32, i32) {
    %c0_i32 = arith.constant 0 : i32
    %c0_i32_0 = arith.constant 0 : i32
    %c0_i32_1 = arith.constant 0 : i32
    return %c0_i32, %c0_i32_0 : i32, i32
  }
  func.func @transform_7(%arg0: i32) -> (i32, i32) {
    %c0_i32 = arith.constant 0 : i32
    %c0_i32_0 = arith.constant 0 : i32
    return %arg0, %c0_i32 : i32, i32
  }
}

</mosaic_0001>

<bundles_post_ra>
// kernel: sentence_similarity_forward.1
= control target key start
LH: loop header
LB: loop body
LE: loop exit
PB: predicated region body
PF: predicated region fallthrough
CT: control target
= control target key end

     0   :  { %13 = vsyncpa [#allocation4], 0  ;;  %s2973_s0 = inlined_call_operand.vmem [shape: bf16[16,768], index: 0, kind: input, shape index: {}]   ;;  %s2974_s1 = inlined_call_operand.vmem [shape: bf16[16,768], index: 1, kind: input, shape index: {}]   ;;  %s2975_s2 = inlined_call_operand.hbm [shape: bf16[768,256], index: 2, kind: input, shape index: {}]   ;;  %s2976_s3 = inlined_call_operand.hbm [shape: bf16[768,256], index: 3, kind: input, shape index: {}]   ;;  %s2977_s4 = inlined_call_operand.vmem [shape: f32[1,256], index: 4, kind: input, shape index: {}]   ;;  %s2978_s5 = inlined_call_operand.vmem [shape: f32[1,256], index: 5, kind: input, shape index: {}]   ;;  %s2979_s6 = inlined_call_operand.<no memory space> [shape: f32[1,1], index: 6, kind: input, shape index: {}]   ;;  %s2980_s7 = inlined_call_operand.vmem [shape: f32[16,1], index: 7, kind: output, shape index: {}]  }
   0x1   :  { %s23_s26 = sshll.u32 %s2975_s2, 4  ;;  %s24_s26 = int_to_ptr.hbm [resolvable:$true] %s23_s26 }
   0x2   :  { %14 = vsyncpa [#allocation6], 0  ;;  %s2786_s27 = smov [#allocation3]   ;;  %s36_s8 = sshll.u32 %s2976_s3, 4  ;;  %s37_s8 = int_to_ptr.hbm [resolvable:$true] %s36_s8 }
   0x3   :  { %s25_s28 = sshll.u32 %s2786_s27, 4  ;;  %s2787_s9 = smov 128   ;;  %s26_s28 = int_to_ptr.vmem [resolvable:$true] %s25_s28 }
   0x4   :  { %s2788_s10 = smov 8   ;;  %s2789_s11 = smov [#allocation5]  }
   0x5   :  { %31 = dma.hbm_to_vmem [thread:$0]  %s24_s26, 12288, %s26_s28, [#allocation4], %s2787_s9, %s2787_s9, %s2788_s10  }
   0x6   :  { %s38_s12 = sshll.u32 %s2789_s11, 4  ;;  %s39_s12 = int_to_ptr.vmem [resolvable:$true] %s38_s12 }
   0x7   :  { %44 = dma.hbm_to_vmem [thread:$0]  %s37_s8, 12288, %s39_s12, [#allocation6], %s2787_s9, %s2787_s9, %s2788_s10  }
   0x8   :  { %2782 = dma.done.wait [#allocation4], 12288  }
   0x9   :  { %2783 = vsyncadd [#allocation4], 4294955008 }
   0xa   :  { %2784 = dma.done.wait [#allocation6], 12288  }
   0xb   :  { %2785 = vsyncadd [#allocation6], 4294955008  ;;  %v1782_v0 = vld [vmem:[#allocation5 + $0x70] sm:$0xf]  ;;  %v2641_v1 = vld [vmem:[#allocation5 + $0x74] sm:$0xf0] }
   0xc   :  { %v1846_v2 = vld [vmem:[#allocation5 + $0xf0] sm:$0xf]  ;;  %v1783_v3 = vor.u32 %v2641_v1, %v1782_v0  ;;  %v2657_v4 = vld [vmem:[#allocation5 + $0xf4] sm:$0xf0]  ;;  %v1774_v11 = vld [vmem:[#allocation5 + $0x60] sm:$0xf] }
   0xd   :  { %v1910_v5 = vld [vmem:[#allocation5 + $0x170] sm:$0xf]  ;;  %v2673_v6 = vld [vmem:[#allocation5 + $0x174] sm:$0xf0]  ;;  %v1847_v7 = vor.u32 %v2657_v4, %v1846_v2  ;;  %v2639_v13 = vld [vmem:[#allocation5 + $0x64] sm:$0xf0] }
   0xe   :  { %v1911_v8 = vor.u32 %v2673_v6, %v1910_v5  ;;  %v1974_v9 = vld [vmem:[#allocation5 + $0x1f0] sm:$0xf]  ;;  %v2689_v10 = vld [vmem:[#allocation5 + $0x1f4] sm:$0xf0]  ;;  %773 = vmatpush.bf16.msra.mxu0 %v1783_v3  ;;  %v1838_v14 = vld [vmem:[#allocation5 + $0xe0] sm:$0xf]  ;;  %v1775_v16 = vor.u32 %v2639_v13, %v1774_v11 }
   0xf   :  { %v1975_v12 = vor.u32 %v2689_v10, %v1974_v9  ;;  %v2655_v15 = vld [vmem:[#allocation5 + $0xe4] sm:$0xf0]  ;;  %787 = vmatpush.bf16.msra.mxu1 %v1847_v7  ;;  %v1902_v18 = vld [vmem:[#allocation5 + $0x160] sm:$0xf]  ;;  %v1766_v23 = vld [vmem:[#allocation5 + $0x50] sm:$0xf] }
  0x10   :  { %801 = vmatpush.bf16.msra.mxu2 %v1911_v8  ;;  %v1839_v17 = vor.u32 %v2655_v15, %v1838_v14  ;;  %v2671_v19 = vld [vmem:[#allocation5 + $0x164] sm:$0xf0]  ;;  %v1966_v20 = vld [vmem:[#allocation5 + $0x1e0] sm:$0xf]  ;;  %v2637_v24 = vld [vmem:[#allocation5 + $0x54] sm:$0xf0] }
  0x11   :  { %815 = vmatpush.bf16.msra.mxu3 %v1975_v12  ;;  %v1903_v21 = vor.u32 %v2671_v19, %v1902_v18  ;;  %v2687_v22 = vld [vmem:[#allocation5 + $0x1e4] sm:$0xf0]  ;;  %v1830_v26 = vld [vmem:[#allocation5 + $0xd0] sm:$0xf]  ;;  %v2653_v27 = vld [vmem:[#allocation5 + $0xd4] sm:$0xf0]  ;;  %v1767_v29 = vor.u32 %v2637_v24, %v1766_v23 }
  0x12   :  { %v1967_v25 = vor.u32 %v2687_v22, %v1966_v20  ;;  %v1894_v28 = vld [vmem:[#allocation5 + $0x150] sm:$0xf]  ;;  %774 = vmatpush.bf16.msra.mxu0 %v1775_v16  ;;  %v2669_v30 = vld [vmem:[#allocation5 + $0x154] sm:$0xf0]  ;;  %v1831_v33 = vor.u32 %v2653_v27, %v1830_v26  ;;  %v1758_v35 = vld [vmem:[#allocation5 + $0x40] sm:$0xf] }
  0x13   :  { %v1958_v31 = vld [vmem:[#allocation5 + $0x1d0] sm:$0xf]  ;;  %v2685_v32 = vld [vmem:[#allocation5 + $0x1d4] sm:$0xf0]  ;;  %788 = vmatpush.bf16.msra.mxu1 %v1839_v17  ;;  %v1895_v34 = vor.u32 %v2669_v30, %v1894_v28  ;;  %v2635_v36 = vld [vmem:[#allocation5 + $0x44] sm:$0xf0] }
  0x14   :  { %802 = vmatpush.bf16.msra.mxu2 %v1903_v21  ;;  %v1822_v37 = vld [vmem:[#allocation5 + $0xc0] sm:$0xf]  ;;  %v1959_v38 = vor.u32 %v2685_v32, %v1958_v31  ;;  %v2651_v39 = vld [vmem:[#allocation5 + $0xc4] sm:$0xf0]  ;;  %v1759_v44 = vor.u32 %v2635_v36, %v1758_v35  ;;  %v1750_v47 = vld [vmem:[#allocation5 + $0x30] sm:$0xf] }
  0x15   :  { %816 = vmatpush.bf16.msra.mxu3 %v1967_v25  ;;  %v1886_v40 = vld [vmem:[#allocation5 + $0x140] sm:$0xf]  ;;  %v2667_v41 = vld [vmem:[#allocation5 + $0x144] sm:$0xf0]  ;;  %v1823_v45 = vor.u32 %v2651_v39, %v1822_v37  ;;  %v2633_v48 = vld [vmem:[#allocation5 + $0x34] sm:$0xf0] }
  0x16   :  { %v1950_v42 = vld [vmem:[#allocation5 + $0x1c0] sm:$0xf]  ;;  %v2683_v43 = vld [vmem:[#allocation5 + $0x1c4] sm:$0xf0]  ;;  %775 = vmatpush.bf16.msra.mxu0 %v1767_v29  ;;  %v1887_v46 = vor.u32 %v2667_v41, %v1886_v40  ;;  %v1814_v49 = vld [vmem:[#allocation5 + $0xb0] sm:$0xf]  ;;  %v1751_v56 = vor.u32 %v2633_v48, %v1750_v47 }
  0x17   :  { %789 = vmatpush.bf16.msra.mxu1 %v1831_v33  ;;  %v1951_v50 = vor.u32 %v2683_v43, %v1950_v42  ;;  %v2649_v51 = vld [vmem:[#allocation5 + $0xb4] sm:$0xf0]  ;;  %v1878_v52 = vld [vmem:[#allocation5 + $0x130] sm:$0xf]  ;;  %v1742_v59 = vld [vmem:[#allocation5 + $0x20] sm:$0xf] }
  0x18   :  { %803 = vmatpush.bf16.msra.mxu2 %v1895_v34  ;;  %v2665_v53 = vld [vmem:[#allocation5 + $0x134] sm:$0xf0]  ;;  %v1942_v54 = vld [vmem:[#allocation5 + $0x1b0] sm:$0xf]  ;;  %v1815_v57 = vor.u32 %v2649_v51, %v1814_v49  ;;  %v2631_v60 = vld [vmem:[#allocation5 + $0x24] sm:$0xf0] }
  0x19   :  { %817 = vmatpush.bf16.msra.mxu3 %v1959_v38  ;;  %v2681_v55 = vld [vmem:[#allocation5 + $0x1b4] sm:$0xf0]  ;;  %v1879_v58 = vor.u32 %v2665_v53, %v1878_v52  ;;  %v1806_v61 = vld [vmem:[#allocation5 + $0xa0] sm:$0xf]  ;;  %v2647_v63 = vld [vmem:[#allocation5 + $0xa4] sm:$0xf0]  ;;  %v1743_v4 = vor.u32 %v2631_v60, %v1742_v59 }
  0x1a   :  { %776 = vmatpush.bf16.msra.mxu0 %v1759_v44  ;;  %v1943_v62 = vor.u32 %v2681_v55, %v1942_v54  ;;  %v1870_v0 = vld [vmem:[#allocation5 + $0x120] sm:$0xf]  ;;  %v2663_v1 = vld [vmem:[#allocation5 + $0x124] sm:$0xf0]  ;;  %v1807_v5 = vor.u32 %v2647_v63, %v1806_v61  ;;  %v1734_v7 = vld [vmem:[#allocation5 + $0x10] sm:$0xf] }
  0x1b   :  { %790 = vmatpush.bf16.msra.mxu1 %v1823_v45  ;;  %v1934_v2 = vld [vmem:[#allocation5 + $0x1a0] sm:$0xf]  ;;  %v2679_v3 = vld [vmem:[#allocation5 + $0x1a4] sm:$0xf0]  ;;  %v1871_v6 = vor.u32 %v2663_v1, %v1870_v0  ;;  %v2629_v8 = vld [vmem:[#allocation5 + $0x14] sm:$0xf0] }
  0x1c   :  { %804 = vmatpush.bf16.msra.mxu2 %v1887_v46  ;;  %v1798_v9 = vld [vmem:[#allocation5 + $0x90] sm:$0xf]  ;;  %v1935_v10 = vor.u32 %v2679_v3, %v1934_v2  ;;  %v2645_v11 = vld [vmem:[#allocation5 + $0x94] sm:$0xf0]  ;;  %v1735_v16 = vor.u32 %v2629_v8, %v1734_v7  ;;  %v1726_v17 = vld [vmem:[#allocation5] sm:$0xf] }
  0x1d   :  { %818 = vmatpush.bf16.msra.mxu3 %v1951_v50  ;;  %v1862_v12 = vld [vmem:[#allocation5 + $0x110] sm:$0xf]  ;;  %v2661_v13 = vld [vmem:[#allocation5 + $0x114] sm:$0xf0]  ;;  %v2627_v18 = vld [vmem:[#allocation5 + $0x4] sm:$0xf0]  ;;  %v1799_v19 = vor.u32 %v2645_v11, %v1798_v9 }
  0x1e   :  { %777 = vmatpush.bf16.msra.mxu0 %v1751_v56  ;;  %v1926_v14 = vld [vmem:[#allocation5 + $0x190] sm:$0xf]  ;;  %v2677_v15 = vld [vmem:[#allocation5 + $0x194] sm:$0xf0]  ;;  %v1863_v20 = vor.u32 %v2661_v13, %v1862_v12  ;;  %v1790_v21 = vld [vmem:[#allocation5 + $0x80] sm:$0xf]  ;;  %v1727_v31 = vor.u32 %v2627_v18, %v1726_v17 }
  0x1f   :  { %791 = vmatpush.bf16.msra.mxu1 %v1815_v57  ;;  %v2643_v22 = vld [vmem:[#allocation5 + $0x84] sm:$0xf0]  ;;  %v1854_v23 = vld [vmem:[#allocation5 + $0x100] sm:$0xf]  ;;  %v1927_v24 = vor.u32 %v2677_v15, %v1926_v14  ;;  %v2038_v28 = vld [vmem:[#allocation5 + $0x270] sm:$0xf] }
  0x20   :  { %805 = vmatpush.bf16.msra.mxu2 %v1879_v58  ;;  %v2659_v25 = vld [vmem:[#allocation5 + $0x104] sm:$0xf0]  ;;  %v1918_v26 = vld [vmem:[#allocation5 + $0x180] sm:$0xf]  ;;  %v2705_v29 = vld [vmem:[#allocation5 + $0x274] sm:$0xf0]  ;;  %v1791_v35 = vor.u32 %v2643_v22, %v1790_v21 }
  0x21   :  { %819 = vmatpush.bf16.msra.mxu3 %v1943_v62  ;;  %v2675_v27 = vld [vmem:[#allocation5 + $0x184] sm:$0xf0]  ;;  %v2102_v30 = vld [vmem:[#allocation5 + $0x2f0] sm:$0xf]  ;;  %v2721_v32 = vld [vmem:[#allocation5 + $0x2f4] sm:$0xf0]  ;;  %v1855_v36 = vor.u32 %v2659_v25, %v1854_v23  ;;  %v2039_v40 = vor.u32 %v2705_v29, %v2038_v28 }
  0x22   :  { %778 = vmatpush.bf16.msra.mxu0 %v1743_v4  ;;  %v2640_v33 = vld [vmem:[#allocation5 + $0x74] sm:$0xf]  ;;  %v1784_v34 = vld [vmem:[#allocation5 + $0x78] sm:$0xf0]  ;;  %v1919_v39 = vor.u32 %v2675_v27, %v1918_v26  ;;  %v2030_v41 = vld [vmem:[#allocation5 + $0x260] sm:$0xf]  ;;  %v2103_v42 = vor.u32 %v2721_v32, %v2102_v30 }
  0x23   :  { %792 = vmatpush.bf16.msra.mxu1 %v1807_v5  ;;  %v2656_v37 = vld [vmem:[#allocation5 + $0xf4] sm:$0xf]  ;;  %v1848_v38 = vld [vmem:[#allocation5 + $0xf8] sm:$0xf0]  ;;  %v1787_v43 = vor.u32 %v2640_v33, %v1784_v34  ;;  %v2703_v44 = vld [vmem:[#allocation5 + $0x264] sm:$0xf0] }
  0x24   :  { %806 = vmatpush.bf16.msra.mxu2 %v1871_v6  ;;  %v2094_v45 = vld [vmem:[#allocation5 + $0x2e0] sm:$0xf]  ;;  %v2719_v46 = vld [vmem:[#allocation5 + $0x2e4] sm:$0xf0]  ;;  %v1851_v47 = vor.u32 %v2656_v37, %v1848_v38  ;;  %v2638_v48 = vld [vmem:[#allocation5 + $0x64] sm:$0xf]  ;;  %v2031_v54 = vor.u32 %v2703_v44, %v2030_v41 }
  0x25   :  { %820 = vmatpush.bf16.msra.mxu3 %v1935_v10  ;;  %v1776_v49 = vld [vmem:[#allocation5 + $0x68] sm:$0xf0]  ;;  %v2654_v50 = vld [vmem:[#allocation5 + $0xe4] sm:$0xf]  ;;  %v1702_v52 = vld [vmem:[%s2974_s1] sm:$0xf]  ;;  %v2095_v59 = vor.u32 %v2719_v46, %v2094_v45 }
  0x26   :  { %779 = vmatpush.bf16.msra.mxu0 %v1735_v16  ;;  %v1840_v51 = vld [vmem:[#allocation5 + $0xe8] sm:$0xf0]  ;;  %v2623_v53 = vld [vmem:[%s2974_s1 + $0x14] sm:$0xf0]  ;;  %v2022_v55 = vld [vmem:[#allocation5 + $0x250] sm:$0xf]  ;;  %v1779_v60 = vor.u32 %v2638_v48, %v1776_v49 }
  0x27   :  { %793 = vmatpush.bf16.msra.mxu1 %v1799_v19  ;;  %v2701_v56 = vld [vmem:[#allocation5 + $0x254] sm:$0xf0]  ;;  %v2086_v57 = vld [vmem:[#allocation5 + $0x2d0] sm:$0xf]  ;;  %v2842_v58 = vor.u32 %v2623_v53, %v1702_v52  ;;  %v2636_v62 = vld [vmem:[#allocation5 + $0x54] sm:$0xf]  ;;  %v1843_v0 = vor.u32 %v2654_v50, %v1840_v51 }
  0x28   :  { %807 = vmatpush.bf16.msra.mxu2 %v1863_v20  ;;  %v2717_v61 = vld [vmem:[#allocation5 + $0x2d4] sm:$0xf0]  ;;  %v1768_v63 = vld [vmem:[#allocation5 + $0x58] sm:$0xf0]  ;;  %v2652_v1 = vld [vmem:[#allocation5 + $0xd4] sm:$0xf]  ;;  %v2023_v8 = vor.u32 %v2701_v56, %v2022_v55 }
  0x29   :  { %821 = vmatpush.bf16.msra.mxu3 %v1927_v24  ;;  %v2620_v2 = vld [vmem:[%s2974_s1 + $0x4] sm:$0xf]  ;;  %v1704_v3 = vld [vmem:[%s2974_s1 + $0x18] sm:$0xf0]  ;;  %v1710_v6 = vld [vmem:[%s2974_s1 + $0x8] sm:$0xf]  ;;  %v2087_v12 = vor.u32 %v2717_v61, %v2086_v57  ;;  %v1771_v13 = vor.u32 %v2636_v62, %v1768_v63 }
  0x2a   :  { %780 = vmatpush.bf16.msra.mxu0 %v1727_v31  ;;  %v1832_v4 = vld [vmem:[#allocation5 + $0xd8] sm:$0xf0]  ;;  %v2851_v5 = vor.u32 %v2620_v2, %v1704_v3  ;;  %v2624_v7 = vld [vmem:[%s2974_s1 + $0x1c] sm:$0xf0]  ;;  %v2699_v10 = vld [vmem:[#allocation5 + $0x244] sm:$0xf0] }
  0x2b   :  { %794 = vmatpush.bf16.msra.mxu1 %v1791_v35  ;;  %v2014_v9 = vld [vmem:[#allocation5 + $0x240] sm:$0xf]  ;;  %v2859_v11 = vor.u32 %v2624_v7, %v1710_v6  ;;  %v2715_v15 = vld [vmem:[#allocation5 + $0x2c4] sm:$0xf0]  ;;  %v2634_v16 = vld [vmem:[#allocation5 + $0x44] sm:$0xf]  ;;  %v1835_v17 = vor.u32 %v2652_v1, %v1832_v4 }
  0x2c   :  { %808 = vmatpush.bf16.msra.mxu2 %v1855_v36  ;;  %v2078_v14 = vld [vmem:[#allocation5 + $0x2c0] sm:$0xf]  ;;  %v1760_v18 = vld [vmem:[#allocation5 + $0x48] sm:$0xf0]  ;;  %v1712_v20 = vld [vmem:[%s2974_s1 + $0x20] sm:$0xf0]  ;;  %v2015_v24 = vor.u32 %v2699_v10, %v2014_v9 }
  0x2d   :  { %822 = vmatpush.bf16.msra.mxu3 %v1919_v39  ;;  %781 = vmatmul.bf16.vlgmr.msra.gmra.mxu0 %v2842_v58  ;;  %v2621_v19 = vld [vmem:[%s2974_s1 + $0xc] sm:$0xf]  ;;  %v2650_v21 = vld [vmem:[#allocation5 + $0xc4] sm:$0xf]  ;;  %v2079_v25 = vor.u32 %v2715_v15, %v2078_v14  ;;  %v1763_v26 = vor.u32 %v2634_v16, %v1760_v18  ;;  %v2006_v27 = vld [vmem:[#allocation5 + $0x230] sm:$0xf] }
  0x2e   :  { %829 = vmatpush.bf16.msrb.mxu0 %v2039_v40  ;;  %795 = vmatmul.bf16.vlgmr.msra.gmra.mxu1 %v2851_v5  ;;  %v1824_v22 = vld [vmem:[#allocation5 + $0xc8] sm:$0xf0]  ;;  %v2869_v23 = vor.u32 %v2621_v19, %v1712_v20  ;;  %v2697_v28 = vld [vmem:[#allocation5 + $0x234] sm:$0xf0]  ;;  %v2070_v29 = vld [vmem:[#allocation5 + $0x2b0] sm:$0xf] }
  0x2f   :  { %843 = vmatpush.bf16.msrb.mxu1 %v2103_v42  ;;  %809 = vmatmul.bf16.vlgmr.msra.gmra.mxu2 %v2859_v11  ;;  %v1827_v30 = vor.u32 %v2650_v21, %v1824_v22  ;;  %v2713_v31 = vld [vmem:[#allocation5 + $0x2b4] sm:$0xf0]  ;;  %v2632_v32 = vld [vmem:[#allocation5 + $0x34] sm:$0xf]  ;;  %v1752_v33 = vld [vmem:[#allocation5 + $0x38] sm:$0xf0]  ;;  %v2007_v36 = vor.u32 %v2697_v28, %v2006_v27 }
  0x30   :  { %857 = vmatpush.bf16.msrb.mxu2 %v1787_v43  ;;  %v2648_v34 = vld [vmem:[#allocation5 + $0xb4] sm:$0xf]  ;;  %v1816_v35 = vld [vmem:[#allocation5 + $0xb8] sm:$0xf0]  ;;  %823 = vmatmul.bf16.vlgmr.msra.gmra.mxu3 %v2869_v23  ;;  %v2071_v37 = vor.u32 %v2713_v31, %v2070_v29  ;;  %v1755_v38 = vor.u32 %v2632_v32, %v1752_v33  ;;  %v1998_v39 = vld [vmem:[#allocation5 + $0x220] sm:$0xf] }
  0x31   :  { %871 = vmatpush.bf16.msrb.mxu3 %v1851_v47  ;;  %v2695_v40 = vld [vmem:[#allocation5 + $0x224] sm:$0xf0]  ;;  %v2062_v41 = vld [vmem:[#allocation5 + $0x2a0] sm:$0xf]  ;;  %v1819_v42 = vor.u32 %v2648_v34, %v1816_v35  ;;  %v2630_v44 = vld [vmem:[#allocation5 + $0x24] sm:$0xf] }
  0x32   :  { %830 = vmatpush.bf16.msrb.mxu0 %v2031_v54  ;;  %v2711_v43 = vld [vmem:[#allocation5 + $0x2a4] sm:$0xf0]  ;;  %v1744_v45 = vld [vmem:[#allocation5 + $0x28] sm:$0xf0]  ;;  %v2646_v46 = vld [vmem:[#allocation5 + $0xa4] sm:$0xf]  ;;  %v1999_v48 = vor.u32 %v2695_v40, %v1998_v39 }
  0x33   :  { %844 = vmatpush.bf16.msrb.mxu1 %v2095_v59  ;;  %v1808_v47 = vld [vmem:[#allocation5 + $0xa8] sm:$0xf0]  ;;  %v2063_v49 = vor.u32 %v2711_v43, %v2062_v41  ;;  %v1747_v50 = vor.u32 %v2630_v44, %v1744_v45  ;;  %v1990_v51 = vld [vmem:[#allocation5 + $0x210] sm:$0xf]  ;;  %v2693_v52 = vld [vmem:[#allocation5 + $0x214] sm:$0xf0] }
  0x34   :  { %858 = vmatpush.bf16.msrb.mxu2 %v1779_v60  ;;  %v2054_v53 = vld [vmem:[#allocation5 + $0x290] sm:$0xf]  ;;  %v1811_v54 = vor.u32 %v2646_v46, %v1808_v47  ;;  %v2709_v55 = vld [vmem:[#allocation5 + $0x294] sm:$0xf0]  ;;  %v2628_v56 = vld [vmem:[#allocation5 + $0x14] sm:$0xf]  ;;  %v1991_v61 = vor.u32 %v2693_v52, %v1990_v51 }
  0x35   :  { %872 = vmatpush.bf16.msrb.mxu3 %v1843_v0  ;;  %v1736_v57 = vld [vmem:[#allocation5 + $0x18] sm:$0xf0]  ;;  %v2644_v59 = vld [vmem:[#allocation5 + $0x94] sm:$0xf]  ;;  %v1982_v62 = vld [vmem:[#allocation5 + $0x200] sm:$0xf]  ;;  %v2055_v1 = vor.u32 %v2709_v55, %v2054_v53 }
  0x36   :  { %831 = vmatpush.bf16.msrb.mxu0 %v2023_v8  ;;  %v1800_v60 = vld [vmem:[#allocation5 + $0x98] sm:$0xf0]  ;;  %v2691_v63 = vld [vmem:[#allocation5 + $0x204] sm:$0xf0]  ;;  %v2046_v0 = vld [vmem:[#allocation5 + $0x280] sm:$0xf]  ;;  %v1739_v2 = vor.u32 %v2628_v56, %v1736_v57 }
  0x37   :  { %845 = vmatpush.bf16.msrb.mxu1 %v2087_v12  ;;  %v2707_v3 = vld [vmem:[#allocation5 + $0x284] sm:$0xf0]  ;;  %v2626_v4 = vld [vmem:[#allocation5 + $0x4] sm:$0xf]  ;;  %v1728_v6 = vld [vmem:[#allocation5 + $0x8] sm:$0xf0]  ;;  %v1803_v7 = vor.u32 %v2644_v59, %v1800_v60  ;;  %v1983_v15 = vor.u32 %v2691_v63, %v1982_v62 }
  0x38   :  { %859 = vmatpush.bf16.msrb.mxu2 %v1771_v13  ;;  %v2642_v8 = vld [vmem:[#allocation5 + $0x84] sm:$0xf]  ;;  %v1792_v9 = vld [vmem:[#allocation5 + $0x88] sm:$0xf0]  ;;  %v2672_v10 = vld [vmem:[#allocation5 + $0x174] sm:$0xf]  ;;  %v2047_v19 = vor.u32 %v2707_v3, %v2046_v0  ;;  %v1731_v20 = vor.u32 %v2626_v4, %v1728_v6 }
  0x39   :  { %873 = vmatpush.bf16.msrb.mxu3 %v1835_v17  ;;  %v1912_v12 = vld [vmem:[#allocation5 + $0x178] sm:$0xf0]  ;;  %v2688_v13 = vld [vmem:[#allocation5 + $0x1f4] sm:$0xf]  ;;  %v1718_v22 = vld [vmem:[%s2974_s1 + $0x10] sm:$0xf] }
  0x3a   :  { %832 = vmatpush.bf16.msrb.mxu0 %v2015_v24  ;;  %v1976_v14 = vld [vmem:[#allocation5 + $0x1f8] sm:$0xf0]  ;;  %v2704_v16 = vld [vmem:[#allocation5 + $0x274] sm:$0xf]  ;;  %v2625_v24 = vld [vmem:[%s2974_s1 + $0x24] sm:$0xf0] }
  0x3b   :  { %846 = vmatpush.bf16.msrb.mxu1 %v2079_v25  ;;  %v2040_v17 = vld [vmem:[#allocation5 + $0x278] sm:$0xf0]  ;;  %v2720_v18 = vld [vmem:[#allocation5 + $0x2f4] sm:$0xf]  ;;  %v1795_v25 = vor.u32 %v2642_v8, %v1792_v9  ;;  %v1720_v28 = vld [vmem:[%s2974_s1 + $0x28] sm:$0xf0]  ;;  %v1979_v29 = vor.u32 %v2688_v13, %v1976_v14  ;;  %v2884_v35 = vor.u32 %v2625_v24, %v1718_v22 }
  0x3c   :  { %860 = vmatpush.bf16.msrb.mxu2 %v1763_v26  ;;  %v2104_v21 = vld [vmem:[#allocation5 + $0x2f8] sm:$0xf0]  ;;  %v1915_v26 = vor.u32 %v2672_v10, %v1912_v12  ;;  %v2622_v27 = vld [vmem:[%s2974_s1 + $0x14] sm:$0xf]  ;;  %v2670_v31 = vld [vmem:[#allocation5 + $0x164] sm:$0xf] }
  0x3d   :  { %874 = vmatpush.bf16.msrb.mxu3 %v1827_v30  ;;  %v2043_v30 = vor.u32 %v2704_v16, %v2040_v17  ;;  %v1904_v32 = vld [vmem:[#allocation5 + $0x168] sm:$0xf0]  ;;  %v2686_v33 = vld [vmem:[#allocation5 + $0x1e4] sm:$0xf]  ;;  %v2107_v34 = vor.u32 %v2720_v18, %v2104_v21  ;;  %v2886_v39 = vor.u32 %v2622_v27, %v1720_v28  ;;  %v2668_v45 = vld [vmem:[#allocation5 + $0x154] sm:$0xf] }
  0x3e   :  { %833 = vmatpush.bf16.msrb.mxu0 %v2007_v36  ;;  %v1968_v36 = vld [vmem:[#allocation5 + $0x1e8] sm:$0xf0]  ;;  %v2718_v40 = vld [vmem:[#allocation5 + $0x2e4] sm:$0xf]  ;;  %v1896_v46 = vld [vmem:[#allocation5 + $0x158] sm:$0xf0] }
  0x3f   :  { %847 = vmatpush.bf16.msrb.mxu1 %v2071_v37  ;;  %v2702_v37 = vld [vmem:[#allocation5 + $0x264] sm:$0xf]  ;;  %v2096_v41 = vld [vmem:[#allocation5 + $0x2e8] sm:$0xf0]  ;;  %v1971_v43 = vor.u32 %v2686_v33, %v1968_v36  ;;  %v2684_v47 = vld [vmem:[#allocation5 + $0x1d4] sm:$0xf] }
  0x40   :  { %861 = vmatpush.bf16.msrb.mxu2 %v1755_v38  ;;  %v2032_v38 = vld [vmem:[#allocation5 + $0x268] sm:$0xf0]  ;;  %v2024_v51 = vld [vmem:[#allocation5 + $0x258] sm:$0xf0]  ;;  %v2716_v52 = vld [vmem:[#allocation5 + $0x2d4] sm:$0xf] }
  0x41   :  { %875 = vmatpush.bf16.msrb.mxu3 %v1819_v42  ;;  %v1907_v42 = vor.u32 %v2670_v31, %v1904_v32  ;;  %v2035_v44 = vor.u32 %v2702_v37, %v2032_v38  ;;  %v2088_v53 = vld [vmem:[#allocation5 + $0x2d8] sm:$0xf0]  ;;  %v2666_v57 = vld [vmem:[#allocation5 + $0x144] sm:$0xf]  ;;  %v1888_v59 = vld [vmem:[#allocation5 + $0x148] sm:$0xf0] }
  0x42   :  { %834 = vmatpush.bf16.msrb.mxu0 %v1999_v48  ;;  %v2099_v48 = vor.u32 %v2718_v40, %v2096_v41  ;;  %v2682_v60 = vld [vmem:[#allocation5 + $0x1c4] sm:$0xf]  ;;  %v1952_v62 = vld [vmem:[#allocation5 + $0x1c8] sm:$0xf0]  ;;  %v2664_v4 = vld [vmem:[#allocation5 + $0x134] sm:$0xf] }
  0x43   :  { %848 = vmatpush.bf16.msrb.mxu1 %v2063_v49  ;;  %v1960_v49 = vld [vmem:[#allocation5 + $0x1d8] sm:$0xf0]  ;;  %v2698_v63 = vld [vmem:[#allocation5 + $0x244] sm:$0xf]  ;;  %v2016_v0 = vld [vmem:[#allocation5 + $0x248] sm:$0xf0]  ;;  %v1955_v3 = vor.u32 %v2682_v60, %v1952_v62 }
  0x44   :  { %862 = vmatpush.bf16.msrb.mxu2 %v1747_v50  ;;  %v2700_v50 = vld [vmem:[#allocation5 + $0x254] sm:$0xf]  ;;  %v1963_v55 = vor.u32 %v2684_v47, %v1960_v49  ;;  %v1880_v6 = vld [vmem:[#allocation5 + $0x138] sm:$0xf0]  ;;  %v2662_v18 = vld [vmem:[#allocation5 + $0x124] sm:$0xf] }
  0x45   :  { %876 = vmatpush.bf16.msrb.mxu3 %v1811_v54  ;;  %v1899_v54 = vor.u32 %v2668_v45, %v1896_v46  ;;  %v2027_v56 = vor.u32 %v2700_v50, %v2024_v51  ;;  %v1944_v9 = vld [vmem:[#allocation5 + $0x1b8] sm:$0xf0]  ;;  %v2696_v10 = vld [vmem:[#allocation5 + $0x234] sm:$0xf]  ;;  %v1936_v22 = vld [vmem:[#allocation5 + $0x1a8] sm:$0xf0] }
  0x46   :  { %835 = vmatpush.bf16.msrb.mxu0 %v1991_v61  ;;  %v2091_v61 = vor.u32 %v2716_v52, %v2088_v53  ;;  %v2008_v12 = vld [vmem:[#allocation5 + $0x238] sm:$0xf0]  ;;  %v2712_v13 = vld [vmem:[#allocation5 + $0x2b4] sm:$0xf]  ;;  %v2694_v24 = vld [vmem:[#allocation5 + $0x224] sm:$0xf] }
  0x47   :  { %849 = vmatpush.bf16.msrb.mxu1 %v2055_v1  ;;  %v2714_v1 = vld [vmem:[#allocation5 + $0x2c4] sm:$0xf]  ;;  %v2072_v14 = vld [vmem:[#allocation5 + $0x2b8] sm:$0xf0]  ;;  %v2011_v17 = vor.u32 %v2696_v10, %v2008_v12  ;;  %v2064_v27 = vld [vmem:[#allocation5 + $0x2a8] sm:$0xf0] }
  0x48   :  { %863 = vmatpush.bf16.msrb.mxu2 %v1739_v2  ;;  %v2080_v2 = vld [vmem:[#allocation5 + $0x2c8] sm:$0xf0]  ;;  %v2075_v21 = vor.u32 %v2712_v13, %v2072_v14  ;;  %v2660_v31 = vld [vmem:[#allocation5 + $0x114] sm:$0xf]  ;;  %v1864_v32 = vld [vmem:[#allocation5 + $0x118] sm:$0xf0] }
  0x49   :  { %877 = vmatpush.bf16.msrb.mxu3 %v1803_v7  ;;  %v2680_v7 = vld [vmem:[#allocation5 + $0x1b4] sm:$0xf]  ;;  %v2083_v8 = vor.u32 %v2714_v1, %v2080_v2  ;;  %v1928_v36 = vld [vmem:[#allocation5 + $0x198] sm:$0xf0]  ;;  %v2674_v47 = vld [vmem:[#allocation5 + $0x184] sm:$0xf] }
  0x4a   :  { %836 = vmatpush.bf16.msrb.mxu0 %v1983_v15  ;;  %v1883_v15 = vor.u32 %v2664_v4, %v1880_v6  ;;  %v1947_v16 = vor.u32 %v2680_v7, %v1944_v9  ;;  %v2676_v33 = vld [vmem:[#allocation5 + $0x194] sm:$0xf]  ;;  %v1992_v38 = vld [vmem:[#allocation5 + $0x218] sm:$0xf0]  ;;  %v2690_v49 = vld [vmem:[#allocation5 + $0x204] sm:$0xf] }
  0x4b   :  { %850 = vmatpush.bf16.msrb.mxu1 %v2047_v19  ;;  %v1872_v19 = vld [vmem:[#allocation5 + $0x128] sm:$0xf0]  ;;  %v2692_v37 = vld [vmem:[#allocation5 + $0x214] sm:$0xf]  ;;  %v2056_v41 = vld [vmem:[#allocation5 + $0x298] sm:$0xf0]  ;;  %v1931_v45 = vor.u32 %v2676_v33, %v1928_v36 }
  0x4c   :  { %864 = vmatpush.bf16.msrb.mxu2 %v1731_v20  ;;  %v2678_v20 = vld [vmem:[#allocation5 + $0x1a4] sm:$0xf]  ;;  %v1875_v28 = vor.u32 %v2662_v18, %v1872_v19  ;;  %v2708_v40 = vld [vmem:[#allocation5 + $0x294] sm:$0xf]  ;;  %v1995_v46 = vor.u32 %v2692_v37, %v1992_v38  ;;  %v1984_v51 = vld [vmem:[#allocation5 + $0x208] sm:$0xf0] }
  0x4d   :  { %878 = vmatpush.bf16.msrb.mxu3 %v1795_v25  ;;  %837 = vmatmul.bf16.vlgmr.msrb.gmra.mxu0 %v2884_v35  ;;  %v2000_v25 = vld [vmem:[#allocation5 + $0x228] sm:$0xf0]  ;;  %v2059_v50 = vor.u32 %v2708_v40, %v2056_v41  ;;  %v2706_v52 = vld [vmem:[#allocation5 + $0x284] sm:$0xf]  ;;  %v2318_v60 = vld [vmem:[#allocation3 + $0x170] sm:$0xf] }
  0x4e   :  { %885 = vmatpush.bf16.msra.mxu0 %v1915_v26  ;;  %851 = vmatmul.bf16.vlgmr.msrb.gmra.mxu1 %v2886_v39  ;;  %v2710_v26 = vld [vmem:[#allocation5 + $0x2a4] sm:$0xf]  ;;  %v2048_v53 = vld [vmem:[#allocation5 + $0x288] sm:$0xf0]  ;;  %v2587_v1 = vld [vmem:[#allocation3 + $0x1f4] sm:$0xf0] }
  0x4f   :  { %899 = vmatpush.bf16.msra.mxu1 %v1979_v29  ;;  %865 = vmatmul.bf16.vlgmr.msrb.gmra.mxu2 %v2842_v58  ;;  %v1891_v58 = vor.u32 %v2666_v57, %v1888_v59  ;;  %v1939_v29 = vor.u32 %v2678_v20, %v1936_v22  ;;  %v2555_v59 = vld [vmem:[#allocation3 + $0xf4] sm:$0xf0]  ;;  %v2051_v2 = vor.u32 %v2706_v52, %v2048_v53  ;;  %v2182_v4 = vld [vmem:[#allocation3 + $0x60] sm:$0xf]  ;;  %v2537_v6 = vld [vmem:[#allocation3 + $0x64] sm:$0xf0] }
  0x50   :  { %913 = vmatpush.bf16.msra.mxu2 %v2043_v30  ;;  %879 = vmatmul.bf16.vlgmr.msrb.gmra.mxu3 %v2851_v5  ;;  %v2019_v5 = vor.u32 %v2698_v63, %v2016_v0  ;;  %v2003_v30 = vor.u32 %v2694_v24, %v2000_v25  ;;  %v1987_v63 = vor.u32 %v2690_v49, %v1984_v51  ;;  %v2382_v0 = vld [vmem:[#allocation3 + $0x1f0] sm:$0xf]  ;;  %v2246_v7 = vld [vmem:[#allocation3 + $0xe0] sm:$0xf]  ;;  %v2553_v9 = vld [vmem:[#allocation3 + $0xe4] sm:$0xf0] }
  0x51   :  { %927 = vmatpush.bf16.msra.mxu3 %v2107_v34  ;;  %v2067_v34 = vor.u32 %v2710_v26, %v2064_v27  ;;  %v2310_v10 = vld [vmem:[#allocation3 + $0x160] sm:$0xf]  ;;  %v2569_v12 = vld [vmem:[#allocation3 + $0x164] sm:$0xf0]  ;;  %v2174_v18 = vld [vmem:[#allocation3 + $0x50] sm:$0xf] }
  0x52   :  { %886 = vmatpush.bf16.msra.mxu0 %v1907_v42  ;;  %v1867_v42 = vor.u32 %v2660_v31, %v1864_v32  ;;  %v2374_v13 = vld [vmem:[#allocation3 + $0x1e0] sm:$0xf]  ;;  %v2585_v14 = vld [vmem:[#allocation3 + $0x1e4] sm:$0xf0]  ;;  %v2535_v19 = vld [vmem:[#allocation3 + $0x54] sm:$0xf0] }
  0x53   :  { %900 = vmatpush.bf16.msra.mxu1 %v1971_v43  ;;  %v2658_v43 = vld [vmem:[#allocation5 + $0x104] sm:$0xf]  ;;  %v2238_v20 = vld [vmem:[#allocation3 + $0xd0] sm:$0xf]  ;;  %v2551_v22 = vld [vmem:[#allocation3 + $0xd4] sm:$0xf0] }
  0x54   :  { %914 = vmatpush.bf16.msra.mxu2 %v2035_v44  ;;  %v1856_v44 = vld [vmem:[#allocation5 + $0x108] sm:$0xf0]  ;;  %v2302_v24 = vld [vmem:[#allocation3 + $0x150] sm:$0xf]  ;;  %v2567_v25 = vld [vmem:[#allocation3 + $0x154] sm:$0xf0] }
  0x55   :  { %928 = vmatpush.bf16.msra.mxu3 %v2099_v48  ;;  %v1920_v48 = vld [vmem:[#allocation5 + $0x188] sm:$0xf0]  ;;  %v1859_v57 = vor.u32 %v2658_v43, %v1856_v44  ;;  %v2366_v26 = vld [vmem:[#allocation3 + $0x1d0] sm:$0xf]  ;;  %v2583_v27 = vld [vmem:[#allocation3 + $0x1d4] sm:$0xf0] }
  0x56   :  { %887 = vmatpush.bf16.msra.mxu0 %v1899_v54  ;;  %v2190_v54 = vld [vmem:[#allocation3 + $0x70] sm:$0xf]  ;;  %v1923_v62 = vor.u32 %v2674_v47, %v1920_v48  ;;  %v2166_v31 = vld [vmem:[#allocation3 + $0x40] sm:$0xf]  ;;  %v2367_v33 = vor.u32 %v2583_v27, %v2366_v26  ;;  %v2563_v47 = vld [vmem:[#allocation3 + $0x134] sm:$0xf0] }
  0x57   :  { %901 = vmatpush.bf16.msra.mxu1 %v1963_v55  ;;  %v2539_v55 = vld [vmem:[#allocation3 + $0x74] sm:$0xf0]  ;;  %v2230_v32 = vld [vmem:[#allocation3 + $0xc0] sm:$0xf]  ;;  %v2158_v41 = vld [vmem:[#allocation3 + $0x30] sm:$0xf] }
  0x58   :  { %915 = vmatpush.bf16.msra.mxu2 %v2027_v56  ;;  %v2254_v56 = vld [vmem:[#allocation3 + $0xf0] sm:$0xf]  ;;  %v2294_v36 = vld [vmem:[#allocation3 + $0x140] sm:$0xf]  ;;  %v2579_v49 = vld [vmem:[#allocation3 + $0x1b4] sm:$0xf0] }
  0x59   :  { %929 = vmatpush.bf16.msra.mxu3 %v2091_v61  ;;  %v2571_v61 = vld [vmem:[#allocation3 + $0x174] sm:$0xf0]  ;;  %v2358_v37 = vld [vmem:[#allocation3 + $0x1c0] sm:$0xf]  ;;  %v2222_v43 = vld [vmem:[#allocation3 + $0xb0] sm:$0xf] }
  0x5a   :  { %888 = vmatpush.bf16.msra.mxu0 %v1891_v58  ;;  %v2191_v58 = vor.u32 %v2539_v55, %v2190_v54  ;;  %v2350_v48 = vld [vmem:[#allocation3 + $0x1b0] sm:$0xf]  ;;  %v2150_v53 = vld [vmem:[#allocation3 + $0x20] sm:$0xf]  ;;  %v2529_v54 = vld [vmem:[#allocation3 + $0x24] sm:$0xf0] }
  0x5b   :  { %902 = vmatpush.bf16.msra.mxu1 %v1955_v3  ;;  %v2255_v3 = vor.u32 %v2555_v59, %v2254_v56  ;;  %v2214_v55 = vld [vmem:[#allocation3 + $0xa0] sm:$0xf]  ;;  %v2351_v56 = vor.u32 %v2579_v49, %v2350_v48  ;;  %v2510_v26 = vld [vmem:[#allocation3 + $0x2f0] sm:$0xf]  ;;  %v2619_v27 = vld [vmem:[#allocation3 + $0x2f4] sm:$0xf0] }
  0x5c   :  { %916 = vmatpush.bf16.msra.mxu2 %v2019_v5  ;;  %v2319_v5 = vor.u32 %v2571_v61, %v2318_v60  ;;  %v2278_v59 = vld [vmem:[#allocation3 + $0x120] sm:$0xf]  ;;  %v2561_v60 = vld [vmem:[#allocation3 + $0x124] sm:$0xf0]  ;;  %vm1691_vm2 = vcmask 7168  }
  0x5d   :  { %930 = vmatpush.bf16.msra.mxu3 %v2083_v8  ;;  %v2383_v8 = vor.u32 %v2587_v1, %v2382_v0  ;;  %v2342_v61 = vld [vmem:[#allocation3 + $0x1a0] sm:$0xf]  ;;  %v2142_v0 = vld [vmem:[#allocation3 + $0x10] sm:$0xf] }
  0x5e   :  { %889 = vmatpush.bf16.msra.mxu0 %v1883_v15  ;;  %v2183_v15 = vor.u32 %v2537_v6, %v2182_v4  ;;  %v2270_v6 = vld [vmem:[#allocation3 + $0x110] sm:$0xf] }
  0x5f   :  { %903 = vmatpush.bf16.msra.mxu1 %v1947_v16  ;;  %v2247_v16 = vor.u32 %v2553_v9, %v2246_v7  ;;  %v2559_v7 = vld [vmem:[#allocation3 + $0x114] sm:$0xf0] }
  0x60   :  { %917 = vmatpush.bf16.msra.mxu2 %v2011_v17  ;;  %v2311_v17 = vor.u32 %v2569_v12, %v2310_v10  ;;  %v2575_v9 = vld [vmem:[#allocation3 + $0x194] sm:$0xf0]  ;;  %v2134_v10 = vld [vmem:[#allocation3] sm:$0xf]  ;;  %v2525_v12 = vld [vmem:[#allocation3 + $0x4] sm:$0xf0] }
  0x61   :  { %931 = vmatpush.bf16.msra.mxu3 %v2075_v21  ;;  %v2375_v21 = vor.u32 %v2585_v14, %v2374_v13  ;;  %v2198_v14 = vld [vmem:[#allocation3 + $0x80] sm:$0xf] }
  0x62   :  { %890 = vmatpush.bf16.msra.mxu0 %v1875_v28  ;;  %v2175_v28 = vor.u32 %v2535_v19, %v2174_v18  ;;  %v2271_v19 = vor.u32 %v2559_v7, %v2270_v6 }
  0x63   :  { %904 = vmatpush.bf16.msra.mxu1 %v1939_v29  ;;  %v2239_v29 = vor.u32 %v2551_v22, %v2238_v20  ;;  %v2326_v20 = vld [vmem:[#allocation3 + $0x180] sm:$0xf]  ;;  %v2446_v22 = vld [vmem:[#allocation3 + $0x270] sm:$0xf] }
  0x64   :  { %918 = vmatpush.bf16.msra.mxu2 %v2003_v30  ;;  %v2303_v30 = vor.u32 %v2567_v25, %v2302_v24  ;;  %v2603_v25 = vld [vmem:[#allocation3 + $0x274] sm:$0xf0] }
  0x65   :  { %932 = vmatpush.bf16.msra.mxu3 %v2067_v34  ;;  %v2549_v34 = vld [vmem:[#allocation3 + $0xc4] sm:$0xf0] }
  0x66   :  { %891 = vmatpush.bf16.msra.mxu0 %v1867_v42  ;;  %v2531_v42 = vld [vmem:[#allocation3 + $0x34] sm:$0xf0] }
  0x67   :  { %905 = vmatpush.bf16.msra.mxu1 %v1931_v45  ;;  %v2547_v45 = vld [vmem:[#allocation3 + $0xb4] sm:$0xf0] }
  0x68   :  { %919 = vmatpush.bf16.msra.mxu2 %v1995_v46  ;;  %v2286_v46 = vld [vmem:[#allocation3 + $0x130] sm:$0xf]  ;;  %v2223_v51 = vor.u32 %v2547_v45, %v2222_v43  ;;  %v2511_v43 = vor.u32 %v2619_v27, %v2510_v26  ;;  %v2438_v45 = vld [vmem:[#allocation3 + $0x260] sm:$0xf]  ;;  %v2611_v27 = vld [vmem:[#allocation3 + $0x2b4] sm:$0xf0] }
  0x69   :  { %933 = vmatpush.bf16.msra.mxu3 %v2059_v50  ;;  %v2159_v50 = vor.u32 %v2531_v42, %v2158_v41  ;;  %v2287_v52 = vor.u32 %v2563_v47, %v2286_v46  ;;  %v2519_v41 = vld [vmem:[%s2973_s0 + $0xc] sm:$0xf]  ;;  %v2120_v42 = vld [vmem:[%s2973_s0 + $0x20] sm:$0xf0]  ;;  %v2601_v46 = vld [vmem:[#allocation3 + $0x264] sm:$0xf0] }
  0x6a   :  { %892 = vmatpush.bf16.msra.mxu0 %v1859_v57  ;;  %v2545_v57 = vld [vmem:[#allocation3 + $0xa4] sm:$0xf0]  ;;  %v2502_v47 = vld [vmem:[#allocation3 + $0x2e0] sm:$0xf] }
  0x6b   :  { %906 = vmatpush.bf16.msra.mxu1 %v1923_v62  ;;  %v2577_v62 = vld [vmem:[#allocation3 + $0x1a4] sm:$0xf0]  ;;  %v2215_v1 = vor.u32 %v2545_v57, %v2214_v55  ;;  %v2552_v55 = vld [vmem:[#allocation3 + $0xe4] sm:$0xf]  ;;  %v2926_v57 = vor.u32 %v2519_v41, %v2120_v42  ;;  %v2216_v41 = vld [vmem:[#allocation3 + $0xa8] sm:$0xf0] }
  0x6c   :  { %920 = vmatpush.bf16.msra.mxu2 %v1987_v63  ;;  %v2151_v63 = vor.u32 %v2529_v54, %v2150_v53  ;;  %v2343_v4 = vor.u32 %v2577_v62, %v2342_v61  ;;  %v2430_v62 = vld [vmem:[#allocation3 + $0x250] sm:$0xf] }
  0x6d   :  { %934 = vmatpush.bf16.msra.mxu3 %v2051_v2  ;;  %893 = vmatmul.bf16.vlgmr.msra.gmra.mxu0 %v2859_v11  ;;  %v2533_v11 = vld [vmem:[#allocation3 + $0x44] sm:$0xf0]  ;;  %v2279_v2 = vor.u32 %v2561_v60, %v2278_v59  ;;  %v2439_v59 = vor.u32 %v2601_v46, %v2438_v45  ;;  %v2398_v45 = vld [vmem:[#allocation3 + $0x210] sm:$0xf]  ;;  %v2591_v46 = vld [vmem:[#allocation3 + $0x214] sm:$0xf0] }
  0x6e   :  { %1451 = vmatpush.bf16.msrb.mxu0 %v2191_v58  ;;  %907 = vmatmul.bf16.vlgmr.msra.gmra.mxu1 %v2869_v23  ;;  %v2581_v23 = vld [vmem:[#allocation3 + $0x1c4] sm:$0xf0]  ;;  %v2167_v38 = vor.u32 %v2533_v11, %v2166_v31  ;;  %v2527_v58 = vld [vmem:[#allocation3 + $0x14] sm:$0xf0]  ;;  %v2135_v31 = vor.u32 %v2525_v12, %v2134_v10  ;;  %v2256_v11 = vld [vmem:[#allocation3 + $0xf8] sm:$0xf0] }
  0x6f   :  { %1465 = vmatpush.bf16.msrb.mxu1 %v2255_v3  ;;  %921 = vmatmul.bf16.vlgmr.msra.gmra.mxu2 %v2884_v35  ;;  %v2565_v35 = vld [vmem:[#allocation3 + $0x144] sm:$0xf0]  ;;  %v2359_v44 = vor.u32 %v2581_v23, %v2358_v37  ;;  %v2206_v3 = vld [vmem:[#allocation3 + $0x90] sm:$0xf]  ;;  %v2143_v13 = vor.u32 %v2527_v58, %v2142_v0  ;;  %v2522_v37 = vld [vmem:[%s2973_s0 + $0x1c] sm:$0xf0] }
  0x70   :  { %1479 = vmatpush.bf16.msrb.mxu2 %v2319_v5  ;;  %935 = vmatmul.bf16.vlgmr.msra.gmra.mxu3 %v2886_v39  ;;  %v2231_v39 = vor.u32 %v2549_v34, %v2230_v32  ;;  %v2295_v40 = vor.u32 %v2565_v35, %v2294_v36  ;;  %v2543_v5 = vld [vmem:[#allocation3 + $0x94] sm:$0xf0]  ;;  %v2110_v32 = vld [vmem:[%s2973_s0] sm:$0xf]  ;;  %v2118_v35 = vld [vmem:[%s2973_s0 + $0x8] sm:$0xf] }
  0x71   :  { %1493 = vmatpush.bf16.msrb.mxu3 %v2383_v8  ;;  %v2334_v8 = vld [vmem:[#allocation3 + $0x190] sm:$0xf]  ;;  %v2207_v18 = vor.u32 %v2543_v5, %v2206_v3  ;;  %v2518_v23 = vld [vmem:[%s2973_s0 + $0x4] sm:$0xf]  ;;  %v2922_v53 = vor.u32 %v2522_v37, %v2118_v35  ;;  %v2534_v58 = vld [vmem:[#allocation3 + $0x54] sm:$0xf] }
  0x72   :  { %1452 = vmatpush.bf16.msrb.mxu0 %v2183_v15  ;;  %v2541_v15 = vld [vmem:[#allocation3 + $0x84] sm:$0xf0]  ;;  %v2335_v24 = vor.u32 %v2575_v9, %v2334_v8  ;;  %v2494_v0 = vld [vmem:[#allocation3 + $0x2d0] sm:$0xf]  ;;  %v2176_v3 = vld [vmem:[#allocation3 + $0x58] sm:$0xf0] }
  0x73   :  { %1466 = vmatpush.bf16.msrb.mxu1 %v2247_v16  ;;  %v2262_v16 = vld [vmem:[#allocation3 + $0x100] sm:$0xf]  ;;  %v2199_v34 = vor.u32 %v2541_v15, %v2198_v14  ;;  %v2550_v5 = vld [vmem:[#allocation3 + $0xd4] sm:$0xf]  ;;  %v2179_v8 = vor.u32 %v2534_v58, %v2176_v3  ;;  %v2597_v10 = vld [vmem:[#allocation3 + $0x244] sm:$0xf0] }
  0x74   :  { %1480 = vmatpush.bf16.msrb.mxu2 %v2311_v17  ;;  %v2557_v17 = vld [vmem:[#allocation3 + $0x104] sm:$0xf0]  ;;  %v2422_v9 = vld [vmem:[#allocation3 + $0x240] sm:$0xf]  ;;  %v2532_v15 = vld [vmem:[#allocation3 + $0x44] sm:$0xf] }
  0x75   :  { %1494 = vmatpush.bf16.msrb.mxu3 %v2375_v21  ;;  %v2573_v21 = vld [vmem:[#allocation3 + $0x184] sm:$0xf0]  ;;  %v2263_v36 = vor.u32 %v2557_v17, %v2262_v16  ;;  %v2486_v12 = vld [vmem:[#allocation3 + $0x2c0] sm:$0xf]  ;;  %v2168_v16 = vld [vmem:[#allocation3 + $0x48] sm:$0xf0] }
  0x76   :  { %1453 = vmatpush.bf16.msrb.mxu0 %v2175_v28  ;;  %v2538_v28 = vld [vmem:[#allocation3 + $0x74] sm:$0xf]  ;;  %v2613_v14 = vld [vmem:[#allocation3 + $0x2c4] sm:$0xf0]  ;;  %v2548_v17 = vld [vmem:[#allocation3 + $0xc4] sm:$0xf] }
  0x77   :  { %1467 = vmatpush.bf16.msrb.mxu1 %v2239_v29  ;;  %v2192_v29 = vld [vmem:[#allocation3 + $0x78] sm:$0xf0]  ;;  %v2470_v35 = vld [vmem:[#allocation3 + $0x2a0] sm:$0xf]  ;;  %v2136_v58 = vld [vmem:[#allocation3 + $0x8] sm:$0xf0] }
  0x78   :  { %1481 = vmatpush.bf16.msrb.mxu2 %v2303_v30  ;;  %v2554_v30 = vld [vmem:[#allocation3 + $0xf4] sm:$0xf] }
  0x79   :  { %1495 = vmatpush.bf16.msrb.mxu3 %v2367_v33  ;;  %v2521_v33 = vld [vmem:[%s2973_s0 + $0x14] sm:$0xf0]  ;;  %v2259_v48 = vor.u32 %v2554_v30, %v2256_v11  ;;  %v2546_v30 = vld [vmem:[#allocation3 + $0xb4] sm:$0xf] }
  0x7a   :  { %1454 = vmatpush.bf16.msrb.mxu0 %v2167_v38  ;;  %v2327_v38 = vor.u32 %v2573_v21, %v2326_v20  ;;  %v2920_v49 = vor.u32 %v2521_v33, %v2110_v32  ;;  %v2487_v20 = vor.u32 %v2613_v14, %v2486_v12  ;;  %v2171_v21 = vor.u32 %v2532_v15, %v2168_v16  ;;  %v2602_v12 = vld [vmem:[#allocation3 + $0x274] sm:$0xf] }
  0x7b   :  { %1468 = vmatpush.bf16.msrb.mxu1 %v2231_v39  ;;  %v2447_v39 = vor.u32 %v2603_v25, %v2446_v22  ;;  %v2414_v22 = vld [vmem:[#allocation3 + $0x230] sm:$0xf]  ;;  %v2618_v14 = vld [vmem:[#allocation3 + $0x2f4] sm:$0xf] }
  0x7c   :  { %1482 = vmatpush.bf16.msrb.mxu2 %v2295_v40  ;;  %v2112_v40 = vld [vmem:[%s2973_s0 + $0x18] sm:$0xf0]  ;;  %v2478_v25 = vld [vmem:[#allocation3 + $0x2b0] sm:$0xf] }
  0x7d   :  { %1496 = vmatpush.bf16.msrb.mxu3 %v2359_v44  ;;  %v2195_v44 = vor.u32 %v2538_v28, %v2192_v29  ;;  %v2924_v54 = vor.u32 %v2518_v23, %v2112_v40  ;;  %v2530_v28 = vld [vmem:[#allocation3 + $0x34] sm:$0xf]  ;;  %v2160_v29 = vld [vmem:[#allocation3 + $0x38] sm:$0xf0]  ;;  %v2479_v32 = vor.u32 %v2611_v27, %v2478_v25  ;;  %v2609_v23 = vld [vmem:[#allocation3 + $0x2a4] sm:$0xf0] }
  0x7e   :  { %1455 = vmatpush.bf16.msrb.mxu0 %v2159_v50  ;;  %v2617_v50 = vld [vmem:[#allocation3 + $0x2e4] sm:$0xf0]  ;;  %v2163_v33 = vor.u32 %v2530_v28, %v2160_v29  ;;  %v2544_v40 = vld [vmem:[#allocation3 + $0xa4] sm:$0xf]  ;;  %v2312_v28 = vld [vmem:[#allocation3 + $0x168] sm:$0xf0] }
  0x7f   :  { %1469 = vmatpush.bf16.msrb.mxu1 %v2223_v51  ;;  %v2536_v51 = vld [vmem:[#allocation3 + $0x64] sm:$0xf]  ;;  %v2503_v60 = vor.u32 %v2617_v50, %v2502_v47  ;;  %v2462_v47 = vld [vmem:[#allocation3 + $0x290] sm:$0xf]  ;;  %v2607_v50 = vld [vmem:[#allocation3 + $0x294] sm:$0xf0] }
  0x80   :  { %1483 = vmatpush.bf16.msrb.mxu2 %v2287_v52  ;;  %v2184_v52 = vld [vmem:[#allocation3 + $0x68] sm:$0xf0]  ;;  %v2568_v27 = vld [vmem:[#allocation3 + $0x164] sm:$0xf] }
  0x81   :  { %1497 = vmatpush.bf16.msrb.mxu3 %v2351_v56  ;;  %v2248_v56 = vld [vmem:[#allocation3 + $0xe8] sm:$0xf0]  ;;  %v2187_v61 = vor.u32 %v2536_v51, %v2184_v52  ;;  %v2526_v51 = vld [vmem:[#allocation3 + $0x14] sm:$0xf]  ;;  %v2144_v52 = vld [vmem:[#allocation3 + $0x18] sm:$0xf0] }
  0x82   :  { %1456 = vmatpush.bf16.msrb.mxu0 %v2151_v63  ;;  %v2599_v63 = vld [vmem:[#allocation3 + $0x254] sm:$0xf0]  ;;  %v2584_v29 = vld [vmem:[#allocation3 + $0x1e4] sm:$0xf] }
  0x83   :  { %1470 = vmatpush.bf16.msrb.mxu1 %v2215_v1  ;;  %v2251_v1 = vor.u32 %v2552_v55, %v2248_v56  ;;  %v2431_v6 = vor.u32 %v2599_v63, %v2430_v62  ;;  %v2542_v55 = vld [vmem:[#allocation3 + $0x94] sm:$0xf]  ;;  %v2208_v56 = vld [vmem:[#allocation3 + $0x98] sm:$0xf0]  ;;  %v2454_v62 = vld [vmem:[#allocation3 + $0x280] sm:$0xf]  ;;  %v2463_v63 = vor.u32 %v2607_v50, %v2462_v47 }
  0x84   :  { %1484 = vmatpush.bf16.msrb.mxu2 %v2279_v2  ;;  %v2615_v2 = vld [vmem:[#allocation3 + $0x2d4] sm:$0xf0]  ;;  %v2211_v3 = vor.u32 %v2542_v55, %v2208_v56  ;;  %v2496_v47 = vld [vmem:[#allocation3 + $0x2d8] sm:$0xf0]  ;;  %v2296_v55 = vld [vmem:[#allocation3 + $0x148] sm:$0xf0] }
  0x85   :  { %1498 = vmatpush.bf16.msrb.mxu3 %v2343_v4  ;;  %v2240_v4 = vld [vmem:[#allocation3 + $0xd8] sm:$0xf0]  ;;  %v2495_v7 = vor.u32 %v2615_v2, %v2494_v0  ;;  %v2147_v0 = vor.u32 %v2526_v51, %v2144_v52  ;;  %v2524_v2 = vld [vmem:[#allocation3 + $0x4] sm:$0xf] }
  0x86   :  { %1457 = vmatpush.bf16.msrb.mxu0 %v2143_v13  ;;  %v2243_v13 = vor.u32 %v2550_v5, %v2240_v4  ;;  %v2540_v5 = vld [vmem:[#allocation3 + $0x84] sm:$0xf]  ;;  %v2200_v4 = vld [vmem:[#allocation3 + $0x88] sm:$0xf0]  ;;  %v2139_v16 = vor.u32 %v2524_v2, %v2136_v58  ;;  %v2562_v2 = vld [vmem:[#allocation3 + $0x134] sm:$0xf] }
  0x87   :  { %1471 = vmatpush.bf16.msrb.mxu1 %v2207_v18  ;;  %v2232_v18 = vld [vmem:[#allocation3 + $0xc8] sm:$0xf0]  ;;  %v2564_v52 = vld [vmem:[#allocation3 + $0x144] sm:$0xf]  ;;  %v2288_v58 = vld [vmem:[#allocation3 + $0x138] sm:$0xf0] }
  0x88   :  { %1485 = vmatpush.bf16.msrb.mxu2 %v2271_v19  ;;  %v2423_v19 = vor.u32 %v2597_v10, %v2422_v9  ;;  %v2235_v26 = vor.u32 %v2548_v17, %v2232_v18  ;;  %v2384_v9 = vld [vmem:[#allocation3 + $0x1f8] sm:$0xf0]  ;;  %v2126_v18 = vld [vmem:[%s2973_s0 + $0x10] sm:$0xf]  ;;  %v2580_v56 = vld [vmem:[#allocation3 + $0x1c4] sm:$0xf] }
  0x89   :  { %1499 = vmatpush.bf16.msrb.mxu3 %v2335_v24  ;;  %v2595_v24 = vld [vmem:[#allocation3 + $0x234] sm:$0xf0]  ;;  %v2512_v17 = vld [vmem:[#allocation3 + $0x2f8] sm:$0xf0] }
  0x8a   :  { %1458 = vmatpush.bf16.msrb.mxu0 %v2135_v31  ;;  %v2224_v31 = vld [vmem:[#allocation3 + $0xb8] sm:$0xf0]  ;;  %v2415_v11 = vor.u32 %v2595_v24, %v2414_v22  ;;  %v2520_v22 = vld [vmem:[%s2973_s0 + $0x14] sm:$0xf]  ;;  %v2128_v24 = vld [vmem:[%s2973_s0 + $0x28] sm:$0xf0] }
  0x8b   :  { %1472 = vmatpush.bf16.msrb.mxu1 %v2199_v34  ;;  %v2406_v34 = vld [vmem:[#allocation3 + $0x220] sm:$0xf]  ;;  %v2227_v37 = vor.u32 %v2546_v30, %v2224_v31  ;;  %v2515_v30 = vor.u32 %v2618_v14, %v2512_v17  ;;  %v2560_v17 = vld [vmem:[#allocation3 + $0x124] sm:$0xf] }
  0x8c   :  { %1486 = vmatpush.bf16.msrb.mxu2 %v2263_v36  ;;  %v2593_v36 = vld [vmem:[#allocation3 + $0x224] sm:$0xf0] }
  0x8d   :  { %1500 = vmatpush.bf16.msrb.mxu3 %v2327_v38  ;;  %1459 = vmatmul.bf16.vlgmr.msrb.gmra.mxu0 %v2920_v49  ;;  %v2528_v38 = vld [vmem:[#allocation3 + $0x24] sm:$0xf]  ;;  %v2407_v42 = vor.u32 %v2593_v36, %v2406_v34  ;;  %v2946_v34 = vor.u32 %v2520_v22, %v2128_v24  ;;  %v2408_v24 = vld [vmem:[#allocation3 + $0x228] sm:$0xf0] }
  0x8e   :  { %1507 = vmatpush.bf16.msra.mxu0 %v2447_v39  ;;  %1473 = vmatmul.bf16.vlgmr.msrb.gmra.mxu1 %v2924_v54  ;;  %v2152_v39 = vld [vmem:[#allocation3 + $0x28] sm:$0xf0]  ;;  %v2616_v36 = vld [vmem:[#allocation3 + $0x2e4] sm:$0xf] }
  0x8f   :  { %1521 = vmatpush.bf16.msra.mxu1 %v2511_v43  ;;  %1487 = vmatmul.bf16.vlgmr.msrb.gmra.mxu2 %v2922_v53  ;;  %v2471_v43 = vor.u32 %v2609_v23, %v2470_v35  ;;  %v2504_v35 = vld [vmem:[#allocation3 + $0x2e8] sm:$0xf0]  ;;  %v2592_v22 = vld [vmem:[#allocation3 + $0x224] sm:$0xf] }
  0x90   :  { %1535 = vmatpush.bf16.msra.mxu2 %v2195_v44  ;;  %1501 = vmatmul.bf16.vlgmr.msrb.gmra.mxu3 %v2926_v57  ;;  %v2155_v44 = vor.u32 %v2528_v38, %v2152_v39  ;;  %v2566_v39 = vld [vmem:[#allocation3 + $0x154] sm:$0xf] }
  0x91   :  { %1549 = vmatpush.bf16.msra.mxu3 %v2259_v48  ;;  %v2219_v48 = vor.u32 %v2544_v40, %v2216_v41  ;;  %v2304_v40 = vld [vmem:[#allocation3 + $0x158] sm:$0xf0]  ;;  %v2582_v41 = vld [vmem:[#allocation3 + $0x1d4] sm:$0xf] }
  0x92   :  { %1508 = vmatpush.bf16.msra.mxu0 %v2439_v59  ;;  %v2399_v59 = vor.u32 %v2591_v46, %v2398_v45  ;;  %v2432_v45 = vld [vmem:[#allocation3 + $0x258] sm:$0xf0]  ;;  %v2614_v46 = vld [vmem:[#allocation3 + $0x2d4] sm:$0xf] }
  0x93   :  { %1522 = vmatpush.bf16.msra.mxu1 %v2503_v60  ;;  %v2390_v60 = vld [vmem:[#allocation3 + $0x200] sm:$0xf] }
  0x94   :  { %1536 = vmatpush.bf16.msra.mxu2 %v2187_v61  ;;  %v2589_v61 = vld [vmem:[#allocation3 + $0x204] sm:$0xf0] }
  0x95   :  { %1550 = vmatpush.bf16.msra.mxu3 %v2251_v1  ;;  %v2605_v1 = vld [vmem:[#allocation3 + $0x284] sm:$0xf0]  ;;  %v2391_v10 = vor.u32 %v2589_v61, %v2390_v60  ;;  %v2360_v60 = vld [vmem:[#allocation3 + $0x1c8] sm:$0xf0]  ;;  %v2596_v61 = vld [vmem:[#allocation3 + $0x244] sm:$0xf] }
  0x96   :  { %1509 = vmatpush.bf16.msra.mxu0 %v2431_v6  ;;  %v2570_v6 = vld [vmem:[#allocation3 + $0x174] sm:$0xf]  ;;  %v2455_v15 = vor.u32 %v2605_v1, %v2454_v62  ;;  %v2612_v62 = vld [vmem:[#allocation3 + $0x2c4] sm:$0xf] }
  0x97   :  { %1523 = vmatpush.bf16.msra.mxu1 %v2495_v7  ;;  %v2320_v7 = vld [vmem:[#allocation3 + $0x178] sm:$0xf0] }
  0x98   :  { %1537 = vmatpush.bf16.msra.mxu2 %v2179_v8  ;;  %v2586_v8 = vld [vmem:[#allocation3 + $0x1f4] sm:$0xf] }
  0x99   :  { %1551 = vmatpush.bf16.msra.mxu3 %v2243_v13  ;;  %v2448_v13 = vld [vmem:[#allocation3 + $0x278] sm:$0xf0]  ;;  %v2387_v25 = vor.u32 %v2586_v8, %v2384_v9  ;;  %v2610_v9 = vld [vmem:[#allocation3 + $0x2b4] sm:$0xf] }
  0x9a   :  { %1510 = vmatpush.bf16.msra.mxu0 %v2423_v19  ;;  %v2523_v19 = vld [vmem:[%s2973_s0 + $0x24] sm:$0xf0]  ;;  %v2416_v8 = vld [vmem:[#allocation3 + $0x238] sm:$0xf0] }
  0x9b   :  { %1524 = vmatpush.bf16.msra.mxu1 %v2487_v20  ;;  %v2203_v20 = vor.u32 %v2540_v5, %v2200_v4  ;;  %v2944_v31 = vor.u32 %v2523_v19, %v2126_v18  ;;  %v2280_v18 = vld [vmem:[#allocation3 + $0x128] sm:$0xf0]  ;;  %v2576_v19 = vld [vmem:[#allocation3 + $0x1a4] sm:$0xf] }
  0x9c   :  { %1538 = vmatpush.bf16.msra.mxu2 %v2171_v21  ;;  %v2323_v21 = vor.u32 %v2570_v6, %v2320_v7  ;;  %v2352_v6 = vld [vmem:[#allocation3 + $0x1b8] sm:$0xf0]  ;;  %v2594_v7 = vld [vmem:[#allocation3 + $0x234] sm:$0xf] }
  0x9d   :  { %1552 = vmatpush.bf16.msra.mxu3 %v2235_v26  ;;  %v2451_v26 = vor.u32 %v2602_v12, %v2448_v13  ;;  %v2291_v13 = vor.u32 %v2562_v2, %v2288_v58 }
  0x9e   :  { %1511 = vmatpush.bf16.msra.mxu0 %v2415_v11  ;;  %v2376_v11 = vld [vmem:[#allocation3 + $0x1e8] sm:$0xf0] }
  0x9f   :  { %1525 = vmatpush.bf16.msra.mxu1 %v2479_v32  ;;  %v2600_v32 = vld [vmem:[#allocation3 + $0x264] sm:$0xf]  ;;  %v2379_v23 = vor.u32 %v2584_v29, %v2376_v11  ;;  %v2411_v29 = vor.u32 %v2592_v22, %v2408_v24  ;;  %v2272_v11 = vld [vmem:[#allocation3 + $0x118] sm:$0xf0] }
  0xa0   :  { %1539 = vmatpush.bf16.msra.mxu2 %v2163_v33  ;;  %v2440_v33 = vld [vmem:[#allocation3 + $0x268] sm:$0xf0] }
  0xa1   :  { %1553 = vmatpush.bf16.msra.mxu3 %v2227_v37  ;;  %v2315_v37 = vor.u32 %v2568_v27, %v2312_v28  ;;  %v2443_v38 = vor.u32 %v2600_v32, %v2440_v33  ;;  %v2283_v27 = vor.u32 %v2560_v17, %v2280_v18  ;;  %v2574_v32 = vld [vmem:[#allocation3 + $0x194] sm:$0xf] }
  0xa2   :  { %1512 = vmatpush.bf16.msra.mxu0 %v2407_v42  ;;  %v2507_v42 = vor.u32 %v2616_v36, %v2504_v35  ;;  %v2336_v36 = vld [vmem:[#allocation3 + $0x198] sm:$0xf0]  ;;  %v2590_v35 = vld [vmem:[#allocation3 + $0x214] sm:$0xf] }
  0xa3   :  { %1526 = vmatpush.bf16.msra.mxu1 %v2471_v43  ;;  %v2368_v43 = vld [vmem:[#allocation3 + $0x1d8] sm:$0xf0] }
  0xa4   :  { %1540 = vmatpush.bf16.msra.mxu2 %v2155_v44  ;;  %v2598_v44 = vld [vmem:[#allocation3 + $0x254] sm:$0xf]  ;;  %v2371_v50 = vor.u32 %v2582_v41, %v2368_v43 }
  0xa5   :  { %1554 = vmatpush.bf16.msra.mxu3 %v2219_v48  ;;  %v2307_v48 = vor.u32 %v2566_v39, %v2304_v40  ;;  %v2435_v51 = vor.u32 %v2598_v44, %v2432_v45  ;;  %v2464_v39 = vld [vmem:[#allocation3 + $0x298] sm:$0xf0]  ;;  %v2339_v45 = vor.u32 %v2574_v32, %v2336_v36 }
  0xa6   :  { %1513 = vmatpush.bf16.msra.mxu0 %v2399_v59  ;;  %v2499_v59 = vor.u32 %v2614_v46, %v2496_v47  ;;  %v2556_v47 = vld [vmem:[#allocation3 + $0x104] sm:$0xf] }
  0xa7   :  { %1527 = vmatpush.bf16.msra.mxu1 %v2463_v63  ;;  %v2488_v63 = vld [vmem:[#allocation3 + $0x2c8] sm:$0xf0] }
  0xa8   :  { %1541 = vmatpush.bf16.msra.mxu2 %v2147_v0  ;;  %v2299_v0 = vor.u32 %v2564_v52, %v2296_v55  ;;  %v2491_v4 = vor.u32 %v2612_v62, %v2488_v63  ;;  %v2328_v52 = vld [vmem:[#allocation3 + $0x188] sm:$0xf0]  ;;  %v2588_v55 = vld [vmem:[#allocation3 + $0x204] sm:$0xf] }
  0xa9   :  { %1555 = vmatpush.bf16.msra.mxu3 %v2211_v3  ;;  %v2578_v3 = vld [vmem:[#allocation3 + $0x1b4] sm:$0xf] }
  0xaa   :  { %1514 = vmatpush.bf16.msra.mxu0 %v2391_v10  ;;  %v782_v5 = vpop.f32.mrf.mxu0  ;;  %v2480_v10 = vld [vmem:[#allocation3 + $0x2b8] sm:$0xf0] }
  0xab   :  { %1528 = vmatpush.bf16.msra.mxu1 %v2455_v15  ;;  %v796_v12 = vpop.f32.mrf.mxu1  ;;  %v2355_v15 = vor.u32 %v2578_v3, %v2352_v6 }
  0xac   :  { %1542 = vmatpush.bf16.msra.mxu2 %v2139_v16  ;;  %v797_v14 = vadd.f32 %v796_v12, %v782_v5  ;;  %v2419_v16 = vor.u32 %v2594_v7, %v2416_v8 }
  0xad   :  { %1556 = vmatpush.bf16.msra.mxu3 %v2203_v20  ;;  %1515 = vmatmul.bf16.vlgmr.msra.gmra.mxu0 %v2944_v31  ;;  %v2483_v20 = vor.u32 %v2610_v9, %v2480_v10 }
  0xae   :  { %1563 = vmatpush.bf16.msrb.mxu0 %v2323_v21  ;;  %1529 = vmatmul.bf16.vlgmr.msra.gmra.mxu1 %v2946_v34  ;;  %v2344_v21 = vld [vmem:[#allocation3 + $0x1a8] sm:$0xf0] }
  0xaf   :  { %1577 = vmatpush.bf16.msrb.mxu1 %v2387_v25  ;;  %1543 = vmatmul.bf16.vlgmr.msra.gmra.mxu2 %v2920_v49  ;;  %v2424_v49 = vld [vmem:[#allocation3 + $0x248] sm:$0xf0]  ;;  %v2608_v25 = vld [vmem:[#allocation3 + $0x2a4] sm:$0xf]  ;;  %v2347_v28 = vor.u32 %v2576_v19, %v2344_v21 }
  0xb0   :  { %1591 = vmatpush.bf16.msrb.mxu2 %v2451_v26  ;;  %1557 = vmatmul.bf16.vlgmr.msra.gmra.mxu3 %v2924_v54  ;;  %v2363_v54 = vor.u32 %v2580_v56, %v2360_v60  ;;  %v2427_v1 = vor.u32 %v2596_v61, %v2424_v49  ;;  %v2472_v26 = vld [vmem:[#allocation3 + $0x2a8] sm:$0xf0]  ;;  %v2604_v60 = vld [vmem:[#allocation3 + $0x284] sm:$0xf] }
  0xb1   :  { %1605 = vmatpush.bf16.msrb.mxu3 %v2515_v30  ;;  %v2558_v30 = vld [vmem:[#allocation3 + $0x114] sm:$0xf]  ;;  %v2475_v33 = vor.u32 %v2608_v25, %v2472_v26  ;;  %v2392_v56 = vld [vmem:[#allocation3 + $0x208] sm:$0xf0] }
  0xb2   :  { %1564 = vmatpush.bf16.msrb.mxu0 %v2315_v37  ;;  %v2400_v37 = vld [vmem:[#allocation3 + $0x218] sm:$0xf0]  ;;  %v784_v40 = vpop.f32.mrf.mxu0  ;;  %v2275_v43 = vor.u32 %v2558_v30, %v2272_v11  ;;  %v2456_v61 = vld [vmem:[#allocation3 + $0x288] sm:$0xf0] }
  0xb3   :  { %1578 = vmatpush.bf16.msrb.mxu1 %v2379_v23  ;;  %v810_v23 = vpop.f32.mrf.mxu2  ;;  %v798_v41 = vpop.f32.mrf.mxu1  ;;  %v2403_v46 = vor.u32 %v2590_v35, %v2400_v37 }
  0xb4   :  { %1592 = vmatpush.bf16.msrb.mxu2 %v2443_v38  ;;  %v2606_v38 = vld [vmem:[#allocation3 + $0x294] sm:$0xf]  ;;  %v799_v44 = vadd.f32 %v798_v41, %v784_v40 }
  0xb5   :  { %1606 = vmatpush.bf16.msrb.mxu3 %v2507_v42  ;;  %v811_v42 = vadd.f32 %v810_v23, %v797_v14 }
  0xb6   :  { %1565 = vmatpush.bf16.msrb.mxu0 %v2307_v48  ;;  %v2264_v48 = vld [vmem:[#allocation3 + $0x108] sm:$0xf0] }
  0xb7   :  { %1579 = vmatpush.bf16.msrb.mxu1 %v2371_v50  ;;  %v2572_v50 = vld [vmem:[#allocation3 + $0x184] sm:$0xf]  ;;  %v2267_v62 = vor.u32 %v2556_v47, %v2264_v48 }
  0xb8   :  { %1593 = vmatpush.bf16.msrb.mxu2 %v2435_v51  ;;  %v2467_v51 = vor.u32 %v2606_v38, %v2464_v39  ;;  %v2331_v63 = vor.u32 %v2572_v50, %v2328_v52 }
  0xb9   :  { %1607 = vmatpush.bf16.msrb.mxu3 %v2499_v59  ;;  %v824_v59 = vpop.f32.mrf.mxu3 }
  0xba   :  { %1566 = vmatpush.bf16.msrb.mxu0 %v2299_v0  ;;  %v825_v49 = vadd.f32 %v824_v59, %v811_v42  ;;  %v2395_v0 = vor.u32 %v2588_v55, %v2392_v56  ;;  %v1619_v59 = vld [vmem:[%s2977_s4] sm:$0x3] }
  0xbb   :  { %1580 = vmatpush.bf16.msrb.mxu1 %v2363_v54  ;;  %v2459_v54 = vor.u32 %v2604_v60, %v2456_v61 }
  0xbc   :  { %1594 = vmatpush.bf16.msrb.mxu2 %v2427_v1  ;;  %v812_v1 = vpop.f32.mrf.mxu2 }
  0xbd   :  { %1608 = vmatpush.bf16.msrb.mxu3 %v2491_v4  ;;  %v813_v2 = vadd.f32 %v812_v1, %v799_v44  ;;  %v1621_v1 = vperm.slane %v1619_v59, 0 }
  0xbe   :  { %1567 = vmatpush.bf16.msrb.mxu0 %v2291_v13 }
  0xbf   :  { %1581 = vmatpush.bf16.msrb.mxu1 %v2355_v15 }
  0xc0   :  { %1595 = vmatpush.bf16.msrb.mxu2 %v2419_v16 }
  0xc1   :  { %1609 = vmatpush.bf16.msrb.mxu3 %v2483_v20  ;;  %v826_v58 = vpop.f32.mrf.mxu3 }
  0xc2   :  { %1568 = vmatpush.bf16.msrb.mxu0 %v2283_v27  ;;  %v827_v3 = vadd.f32 %v826_v58, %v813_v2 }
  0xc3   :  { %1582 = vmatpush.bf16.msrb.mxu1 %v2347_v28 }
  0xc4   :  { %1596 = vmatpush.bf16.msrb.mxu2 %v2411_v29 }
  0xc5   :  { %1610 = vmatpush.bf16.msrb.mxu3 %v2475_v33 }
  0xc6   :  { %1569 = vmatpush.bf16.msrb.mxu0 %v2275_v43 }
  0xc7   :  { %1583 = vmatpush.bf16.msrb.mxu1 %v2339_v45 }
  0xc8   :  { %1597 = vmatpush.bf16.msrb.mxu2 %v2403_v46 }
  0xc9   :  { %1611 = vmatpush.bf16.msrb.mxu3 %v2467_v51 }
  0xca   :  { %1570 = vmatpush.bf16.msrb.mxu0 %v2267_v62  ;;  %v838_v5 = vpop.f32.mrf.mxu0 }
  0xcb   :  { %1584 = vmatpush.bf16.msrb.mxu1 %v2331_v63  ;;  %v852_v4 = vpop.f32.mrf.mxu1  ;;  %v839_v25 = vadd.f32 %v838_v5, %v825_v49 }
  0xcc   :  { %1598 = vmatpush.bf16.msrb.mxu2 %v2395_v0 }
  0xcd   :  { %1612 = vmatpush.bf16.msrb.mxu3 %v2459_v54  ;;  %1571 = vmatmul.bf16.vlgmr.msrb.gmra.mxu0 %v2922_v53  ;;  %v853_v30 = vadd.f32 %v852_v4, %v839_v25 }
  0xce   :  { %1585 = vmatmul.bf16.vlgmr.msrb.gmra.mxu1 %v2926_v57 }
  0xcf   :  { %1599 = vmatmul.bf16.vlgmr.msrb.gmra.mxu2 %v2944_v31 }
  0xd0   :  { %1613 = vmatmul.bf16.vlgmr.msrb.gmra.mxu3 %v2946_v34 }
  0xd2   :  { %v866_v6 = vpop.f32.mrf.mxu2  ;;  %v840_v8 = vpop.f32.mrf.mxu0 }
  0xd3   :  { %v880_v7 = vpop.f32.mrf.mxu3  ;;  %v854_v9 = vpop.f32.mrf.mxu1  ;;  %v841_v35 = vadd.f32 %v840_v8, %v827_v3 }
  0xd4   :  { %v881_v24 = vadd.f32 %v880_v7, %v866_v6 }
  0xd5   :  { %v855_v43 = vadd.f32 %v854_v9, %v841_v35 }
  0xda   :  { %v868_v10 = vpop.f32.mrf.mxu2 }
  0xdb   :  { %v882_v12 = vpop.f32.mrf.mxu3 }
  0xdc   :  { %v883_v37 = vadd.f32 %v882_v12, %v868_v10  ;;  %v1622_v12 = vperm.slane %v1619_v59, 1 }
  0xea   :  { %v894_v13 = vpop.f32.mrf.mxu0 }
  0xeb   :  { %v908_v14 = vpop.f32.mrf.mxu1  ;;  %v895_v27 = vadd.f32 %v894_v13, %v881_v24 }
  0xed   :  { %v909_v32 = vadd.f32 %v908_v14, %v895_v27  ;;  %v1633_v14 = vld [vmem:[%s2978_s5] sm:$0x3] }
  0xf2   :  { %v922_v15 = vpop.f32.mrf.mxu2  ;;  %v896_v53 = vpop.f32.mrf.mxu0 }
  0xf3   :  { %v936_v16 = vpop.f32.mrf.mxu3  ;;  %v910_v17 = vpop.f32.mrf.mxu1  ;;  %v923_v23 = vadd.f32 %v922_v15, %v909_v32  ;;  %v897_v40 = vadd.f32 %v896_v53, %v883_v37  ;;  %v1635_v53 = vperm.slane %v1633_v14, 0  ;;  %v1650_v37 = vstv %s2979_s6 }
  0xf5   :  { %v937_v44 = vadd.f32 %v936_v16, %v923_v23  ;;  %v911_v46 = vadd.f32 %v910_v17, %v897_v40 }
  0xfa   :  { %v924_v18 = vpop.f32.mrf.mxu2 }
  0xfb   :  { %v938_v57 = vpop.f32.mrf.mxu3  ;;  %v925_v51 = vadd.f32 %v924_v18, %v911_v46 }
  0xfd   :  { %v939_v62 = vadd.f32 %v938_v57, %v925_v51 }
 0x10a   :  { %v1460_v19 = vpop.f32.mrf.mxu0 }
 0x10b   :  { %v1474_v31 = vpop.f32.mrf.mxu1  ;;  %v1461_v33 = vadd.f32 %v1460_v19, %v853_v30  ;;  %v1636_v19 = vperm.slane %v1633_v14, 1 }
 0x10d   :  { %v1475_v39 = vadd.f32 %v1474_v31, %v1461_v33 }
 0x112   :  { %v1488_v20 = vpop.f32.mrf.mxu2  ;;  %v1462_v21 = vpop.f32.mrf.mxu0 }
 0x113   :  { %v1502_v34 = vpop.f32.mrf.mxu3  ;;  %v1476_v22 = vpop.f32.mrf.mxu1  ;;  %v1489_v42 = vadd.f32 %v1488_v20, %v1475_v39  ;;  %v1463_v47 = vadd.f32 %v1462_v21, %v855_v43 }
 0x115   :  { %v1503_v50 = vadd.f32 %v1502_v34, %v1489_v42  ;;  %v1477_v56 = vadd.f32 %v1476_v22, %v1463_v47 }
 0x11a   :  { %v1490_v26 = vpop.f32.mrf.mxu2 }
 0x11b   :  { %v1504_v28 = vpop.f32.mrf.mxu3  ;;  %v1491_v63 = vadd.f32 %v1490_v26, %v1477_v56 }
 0x11d   :  { %v1505_v3 = vadd.f32 %v1504_v28, %v1491_v63 }
 0x12a   :  { %v1516_v29 = vpop.f32.mrf.mxu0 }
 0x12b   :  { %v1530_v11 = vpop.f32.mrf.mxu1  ;;  %v1517_v52 = vadd.f32 %v1516_v29, %v1503_v50 }
 0x12d   :  { %v1531_v54 = vadd.f32 %v1530_v11, %v1517_v52 }
 0x12f   :  { %v1625_v4 = vadd.f32 %v1621_v1, %v1531_v54 }
 0x131   :  { %v1629_v17 = vmax.f32 %v1625_v4, 0.0 }
 0x132   :  { %v1544_v36 = vpop.f32.mrf.mxu2  ;;  %v1518_v41 = vpop.f32.mrf.mxu0 }
 0x133   :  { %v1558_v38 = vpop.f32.mrf.mxu3  ;;  %v1532_v45 = vpop.f32.mrf.mxu1  ;;  %v1545_v48 = vadd.f32 %v1544_v36, %v937_v44  ;;  %v1519_v7 = vadd.f32 %v1518_v41, %v1505_v3  ;;  %v1639_v25 = vmul.f32 %v1635_v53, %v1629_v17 }
 0x135   :  { %v1559_v60 = vadd.f32 %v1558_v38, %v1545_v48  ;;  %v1533_v18 = vadd.f32 %v1532_v45, %v1519_v7 }
 0x137   :  { %v1627_v22 = vadd.f32 %v1621_v1, %v1533_v18 }
 0x139   :  { %v1631_v30 = vmax.f32 %v1627_v22, 0.0 }
 0x13a   :  { %v1546_v55 = vpop.f32.mrf.mxu2 }
 0x13b   :  { %v1560_v61 = vpop.f32.mrf.mxu3  ;;  %v1547_v58 = vadd.f32 %v1546_v55, %v939_v62  ;;  %v1641_v33 = vmul.f32 %v1635_v53, %v1631_v30 }
 0x13d   :  { %v1561_v8 = vadd.f32 %v1560_v61, %v1547_v58 }
 0x14a   :  { %v1572_v49 = vpop.f32.mrf.mxu0 }
 0x14b   :  { %v1573_v0 = vadd.f32 %v1572_v49, %v1559_v60  ;;  %v1586_v2 = vpop.f32.mrf.mxu1 }
 0x14d   :  { %v1587_v5 = vadd.f32 %v1586_v2, %v1573_v0 }
 0x152   :  { %v1600_v6 = vpop.f32.mrf.mxu2  ;;  %v1574_v13 = vpop.f32.mrf.mxu0 }
 0x153   :  { %v1601_v9 = vadd.f32 %v1600_v6, %v1587_v5  ;;  %v1614_v10 = vpop.f32.mrf.mxu3  ;;  %v1575_v16 = vadd.f32 %v1574_v13, %v1561_v8  ;;  %v1588_v31 = vpop.f32.mrf.mxu1 }
 0x155   :  { %v1615_v15 = vadd.f32 %v1614_v10, %v1601_v9  ;;  %v1589_v34 = vadd.f32 %v1588_v31, %v1575_v16 }
 0x157   :  { %v1626_v57 = vadd.f32 %v1622_v12, %v1615_v15 }
 0x159   :  { %v1630_v20 = vmax.f32 %v1626_v57, 0.0 }
 0x15a   :  { %v1602_v21 = vpop.f32.mrf.mxu2 }
 0x15b   :  { %v1603_v24 = vadd.f32 %v1602_v21, %v1589_v34  ;;  %v1640_v26 = vmul.f32 %v1636_v19, %v1630_v20  ;;  %v1616_v27 = vpop.f32.mrf.mxu3 }
 0x15d   :  { %v1617_v28 = vadd.f32 %v1616_v27, %v1603_v24  ;;  %v1643_v29 = vadd.f32 %v1640_v26, %v1639_v25 }
 0x15f   :  { %v1628_v11 = vadd.f32 %v1622_v12, %v1617_v28  ;;  %1644 = vadd.xlane.f32.xlu0 %v1643_v29 }
 0x161   :  { %v1632_v32 = vmax.f32 %v1628_v11, 0.0 }
 0x163   :  { %v1642_v36 = vmul.f32 %v1636_v19, %v1632_v32 }
 0x165   :  { %v1646_v35 = vadd.f32 %v1642_v36, %v1641_v33 }
 0x167   :  { %1647 = vadd.xlane.f32.xlu0 %v1646_v35 }
 0x1d2   :  { %v1645_v23 = vpop.xlane.xlu0 %1644 }
 0x1d3   :  { %v1651_v38 = vadd.f32 %v1650_v37, %v1645_v23 }
 0x1d5   :  { %v2516_v39 = vmul.f32 -1.442695, %v1651_v38 }
 0x1d7   :  { %2726 = vpow2.f32 %v2516_v39 }
 0x1da   :  { %v1648_v40 = vpop.xlane.xlu0 %1647 }
 0x1db   :  { %v1652_v41 = vadd.f32 %v1650_v37, %v1648_v40 }
 0x1dd   :  { %v2727_v42 = vpop.eup %2726  ;;  %v2517_v43 = vmul.f32 -1.442695, %v1652_v41 }
 0x1de   :  { %v1659_v44 = vadd.f32 1.0, %v2727_v42 }
 0x1df   :  { %2728 = vpow2.f32 %v2517_v43 }
 0x1e0   :  { %2730 = vrcp.f32 %v1659_v44  ;;  %v1672_v51 = vand.u32 2147483648, %v1659_v44  ;;  %v1670_v55 = vand.u32 2147483647, %v1659_v44  ;;  %vm1666_vm1 = vweird.f32 %v1659_v44 }
 0x1e2   :  { %v1673_v60 = vor.u32 1.1754944e-38, %v1672_v51  ;;  %vm1671_vm4 = vcmp.eq.f32.partialorder %v1670_v55, 8.507059e+37 }
 0x1e5   :  { %v2729_v45 = vpop.eup %2728 }
 0x1e6   :  { %v2731_v46 = vpop.eup %2730  ;;  %v1660_v47 = vadd.f32 1.0, %v2729_v45 }
 0x1e7   :  { %v1662_v48 = vmul.f32 %v2731_v46, %v1659_v44  ;;  %vm1667_vm0 = vweird.f32 %v2731_v46 }
 0x1e8   :  { %2732 = vrcp.f32 %v1660_v47  ;;  %vm1668_vm3 = vmor %vm1666_vm1, %vm1667_vm0  ;;  %v1687_v0 = vand.u32 2147483648, %v1660_v47  ;;  %v1685_v1 = vand.u32 2147483647, %v1660_v47  ;;  %vm1681_vm6 = vweird.f32 %v1660_v47 }
 0x1e9   :  { %v1663_v50 = vsub.f32 1.0, %v1662_v48 }
 0x1ea   :  { %v1688_v58 = vor.u32 1.1754944e-38, %v1687_v0  ;;  %vm1686_vm8 = vcmp.eq.f32.partialorder %v1685_v1, 8.507059e+37 }
 0x1eb   :  { %v1664_v52 = vmul.f32 %v2731_v46, %v1663_v50 }
 0x1ed   :  { %v1665_v56 = vadd.f32 %v2731_v46, %v1664_v52 }
 0x1ee   :  { %v2733_v59 = vpop.eup %2732 }
 0x1ef   :  { %v1669_v61 = vsel %vm1668_vm3, %v2731_v46, %v1665_v56  ;;  %v1677_v49 = vmul.f32 %v2733_v59, %v1660_v47  ;;  %vm1682_vm5 = vweird.f32 %v2733_v59 }
 0x1f0   :  { %v1674_v62 = vsel %vm1671_vm4, %v1673_v60, %v1669_v61  ;;  %vm1683_vm7 = vmor %vm1681_vm6, %vm1682_vm5 }
 0x1f1   :  { %1692 = vst.msk [vmem:[%s2980_s7] sm:$0xff] %vm1691_vm2, %v1674_v62  ;;  %v1678_v63 = vsub.f32 1.0, %v1677_v49 }
 0x1f3   :  { %v1679_v54 = vmul.f32 %v2733_v59, %v1678_v63 }
 0x1f5   :  { %v1680_v2 = vadd.f32 %v2733_v59, %v1679_v54 }
 0x1f7   :  { %v1684_v3 = vsel %vm1683_vm7, %v2733_v59, %v1680_v2 }
 0x1f8   :  { %v1689_v5 = vsel %vm1686_vm8, %v1688_v58, %v1684_v3 }
 0x1f9   :  { %1693 = vst.msk [vmem:[%s2980_s7 + $0x8] sm:$0xff] %vm1691_vm2, %v1689_v5 }
 0x1fa   :  { %1698 = vsyncpa [#allocation4], 1 }
 0x1fb   :  { %1699 = vsyncpa [#allocation6], 1 }

</bundles_post_ra>
